<compile_context>
chip_gen: v7x
topology: tpu7x:2x2x1
jax: 0.10.0
libtpu: 0.0.40
codegen_flags: <defaults>
</compile_context>

<pallas_src>
import functools

import jax
import jax.numpy as jnp
from jax.experimental import pallas as pl
from jax.experimental.pallas import tpu as pltpu


# ----------------------------------------------------------------------------
# Fused kernel factory
# ----------------------------------------------------------------------------
def _make_fused_kernel(T, Bp, H, num_layers, num_dirs, unroll):
    S = H * num_dirs              # packed state width  [dir0 | dir1]
    G = 4 * S                     # packed gate width   [i | f | o | g], dir-minor per gate
    n_in = 1 + 3 * num_layers + 2

    def kernel(*refs):
        in_refs = refs[:n_in]
        out_ref, hn_ref, cn_ref = refs[n_in:n_in + 3]
        scratch = list(refs[n_in + 3:])

        x_ref = in_refs[0]
        wdec_ref = in_refs[n_in - 2]
        bdec_ref = in_refs[n_in - 1]

        idx = 0
        xp_scr = scratch[idx]; idx += 1                     # (T*Bp, G) selected proj + bias
        raw_scr = None
        if num_dirs == 2:
            raw_scr = scratch[idx]; idx += 1                # (T*Bp, G) raw projection
        seq_scr = scratch[idx] if num_layers > 1 else None  # (T*Bp, S) layer output seq

        if num_dirs == 2:
            lane = jax.lax.broadcasted_iota(jnp.int32, (Bp, G), 1)
            fwd_mask = (lane % S) < H    # True on forward-direction gate columns

        h_last = None
        for l in range(num_layers):
            wih_ref = in_refs[1 + 3 * l]      # (Din_l, G)
            whh_ref = in_refs[2 + 3 * l]      # (S, G) block-structured
            b_ref = in_refs[3 + 3 * l]        # (1, G)

            # ---- hoisted input projection for all T steps (both directions) ----
            if l == 0:
                xp = jnp.dot(x_ref[...], wih_ref[...],
                             preferred_element_type=jnp.float32)
            else:
                xp = jnp.dot(seq_scr[...], wih_ref[...],
                             preferred_element_type=jnp.float32)

            if num_dirs == 2:
                # Bulk direction selection: xp_sel[t] = fwd cols from xp[t],
                # rev cols from xp[T-1-t], plus bias.  Keeps the serial recurrence
                # to a single contiguous load + add per step.
                raw_scr[...] = xp
                bias = b_ref[...]

                def fill(t, carry):
                    row_f = pl.multiple_of(t * Bp, Bp)
                    row_r = pl.multiple_of((T - 1 - t) * Bp, Bp)
                    xp_scr[pl.ds(row_f, Bp), :] = (
                        jnp.where(fwd_mask,
                                  raw_scr[pl.ds(row_f, Bp), :],
                                  raw_scr[pl.ds(row_r, Bp), :]) + bias)
                    return carry

                jax.lax.fori_loop(0, T, fill, 0, unroll=unroll)
            else:
                xp_scr[...] = xp + b_ref[...]

            whh = whh_ref[...]
            write_seq = (l < num_layers - 1)

            def step(t, carry):
                h_prev, c_prev = carry                       # (Bp, S) each
                row_f = pl.multiple_of(t * Bp, Bp)
                gates = jnp.dot(h_prev, whh,
                                preferred_element_type=jnp.float32)   # (Bp, G)
                gates = gates + xp_scr[pl.ds(row_f, Bp), :]

                # sigmoid only on the 3 sigmoid gates, tanh only on the g gate (EUP)
                sg = jax.nn.sigmoid(gates[:, 0:3 * S])
                g_g = jnp.tanh(gates[:, 3 * S:4 * S])
                i_g = sg[:, 0 * S:1 * S]
                f_g = sg[:, 1 * S:2 * S]
                o_g = sg[:, 2 * S:3 * S]

                c_new = f_g * c_prev + i_g * g_g
                h_new = o_g * jnp.tanh(c_new)

                if write_seq:
                    if num_dirs == 2:
                        row_r = pl.multiple_of((T - 1 - t) * Bp, Bp)
                        seq_scr[pl.ds(row_f, Bp), 0:H] = h_new[:, 0:H]
                        seq_scr[pl.ds(row_r, Bp), H:2 * H] = h_new[:, H:2 * H]
                    else:
                        seq_scr[pl.ds(row_f, Bp), :] = h_new
                return h_new, c_new

            h0 = jnp.zeros((Bp, S), jnp.float32)
            c0 = jnp.zeros((Bp, S), jnp.float32)
            h_fin, c_fin = jax.lax.fori_loop(0, T, step, (h0, c0),
                                             unroll=unroll)

            # lane-dense slab writes; PyTorch (L*nd, B, H) layout produced in wrapper
            hn_ref[l, :, :] = h_fin
            cn_ref[l, :, :] = c_fin
            h_last = h_fin

        # ---- decoder epilogue: feat == [h_fwd_final | h_rev_final] of last layer ----
        # (equals torch.cat((out[:, -1, :H], out[:, 0, H:]), 1); final_dropout is identity
        #  in eval mode).  N=1 output -> VPU broadcast-mul + lane reduce, no MXU push.
        out_ref[...] = (jnp.sum(h_last * wdec_ref[...], axis=1, keepdims=True)
                        + bdec_ref[...])

    return kernel


# ----------------------------------------------------------------------------
# Weight packing: gate order [i, f, o, g] (sigmoid gates first, tanh gate last),
# direction-minor within each gate; block-diagonal W_hh.
# ----------------------------------------------------------------------------
_GATE_ORDER = (0, 1, 3, 2)   # PyTorch row blocks are [i, f, g, o] -> packed as [i, f, o, g]


def _pack_layer_params(p_dirs, H):
    """p_dirs: per-direction dicts with w_ih (4H, Din), w_hh (4H, H), b_ih, b_hh (4H,).
    Returns wih (Din, 4*nd*H), whh (nd*H, 4*nd*H), bias (1, 4*nd*H)."""
    nd = len(p_dirs)
    wih_cols, whh_cols, b_cols = [], [], []
    for g in _GATE_ORDER:
        for d in range(nd):
            p = p_dirs[d]
            wih_cols.append(jnp.transpose(p["w_ih"][g * H:(g + 1) * H, :]))
            blk = [jnp.transpose(p["w_hh"][g * H:(g + 1) * H, :]) if dd == d
                   else jnp.zeros((H, H), jnp.float32) for dd in range(nd)]
            whh_cols.append(jnp.concatenate(blk, axis=0))
            b_cols.append((p["b_ih"] + p["b_hh"])[g * H:(g + 1) * H])
    wih = jnp.concatenate(wih_cols, axis=1)
    whh = jnp.concatenate(whh_cols, axis=1)
    bias = jnp.concatenate(b_cols).reshape(1, 4 * nd * H)
    return wih, whh, bias


# ----------------------------------------------------------------------------
# Model forward (matches BidirectionalLightweightOriginal.forward, eval mode)
# ----------------------------------------------------------------------------
def model_forward(x, params, hidden_dim, num_layers, is_bidirectional):
    """x: (B, T, input_dim), batch-first like the PyTorch module."""
    B, T, Din0 = x.shape
    H = hidden_dim
    nd = 2 if is_bidirectional else 1
    S = nd * H
    G = 4 * S
    Bp = max(8, ((B + 7) // 8) * 8)          # pad batch to a sublane multiple

    # time-major, batch-padded, flattened rows: (T*Bp, Din0)
    x_tb = jnp.transpose(x, (1, 0, 2))
    x_tb = jnp.pad(x_tb, ((0, 0), (0, Bp - B), (0, 0)))
    x2d = x_tb.reshape(T * Bp, Din0)

    inputs = [x2d]
    for l in range(num_layers):
        wih, whh, bias = _pack_layer_params(params["lstm"][l], H)
        inputs += [wih, whh, bias]
    inputs += [params["w_dec"].reshape(1, S), params["b_dec"].reshape(1, 1)]

    scratch = [pltpu.VMEM((T * Bp, G), jnp.float32)]     # selected projection (+bias)
    if nd == 2:
        scratch.append(pltpu.VMEM((T * Bp, G), jnp.float32))   # raw projection
    if num_layers > 1:
        scratch.append(pltpu.VMEM((T * Bp, S), jnp.float32))   # merged layer output seq

    unroll = True if T <= 32 else 4
    kernel = _make_fused_kernel(T, Bp, H, num_layers, nd, unroll)
    out_p, hn_p, cn_p = pl.pallas_call(
        kernel,
        out_shape=(
            jax.ShapeDtypeStruct((Bp, 1), jnp.float32),
            jax.ShapeDtypeStruct((num_layers, Bp, S), jnp.float32),
            jax.ShapeDtypeStruct((num_layers, Bp, S), jnp.float32),
        ),
        scratch_shapes=scratch,
    )(*inputs)

    # split lane-dense (L, Bp, nd*H) slabs into PyTorch (L*nd, B, H) layout
    hn = hn_p.reshape(num_layers, Bp, nd, H).transpose(0, 2, 1, 3)
    hn = hn.reshape(num_layers * nd, Bp, H)[:, :B, :]
    cn = cn_p.reshape(num_layers, Bp, nd, H).transpose(0, 2, 1, 3)
    cn = cn.reshape(num_layers * nd, Bp, H)[:, :B, :]
    return out_p[:B], (hn, cn)


# ----------------------------------------------------------------------------
# Pure-JAX reference (eval-mode PyTorch semantics) for validation
# ----------------------------------------------------------------------------
def reference_forward(x, params, hidden_dim, num_layers, is_bidirectional):
    B, T, _ = x.shape
    H = hidden_dim
    nd = 2 if is_bidirectional else 1
    hp = jax.lax.Precision.HIGHEST

    def run_dir(seq_tbd, p, reverse):
        b = p["b_ih"] + p["b_hh"]
        h = jnp.zeros((B, H), jnp.float32)
        c = jnp.zeros((B, H), jnp.float32)
        outs = [None] * T
        order = range(T - 1, -1, -1) if reverse else range(T)
        for t in order:
            gates = (jnp.dot(seq_tbd[t], p["w_ih"].T, precision=hp)
                     + jnp.dot(h, p["w_hh"].T, precision=hp) + b)
            i = jax.nn.sigmoid(gates[:, 0:H])
            f = jax.nn.sigmoid(gates[:, H:2 * H])
            g = jnp.tanh(gates[:, 2 * H:3 * H])
            o = jax.nn.sigmoid(gates[:, 3 * H:4 * H])
            c = f * c + i * g
            h = o * jnp.tanh(c)
            outs[t] = h
        return jnp.stack(outs, axis=0), h, c

    layer_in = jnp.transpose(x, (1, 0, 2))
    hns, cns = [], []
    for l in range(num_layers):
        outs = []
        for d in range(nd):
            o, h, c = run_dir(layer_in, params["lstm"][l][d], reverse=(d == 1))
            outs.append(o); hns.append(h); cns.append(c)
        layer_in = jnp.concatenate(outs, axis=-1) if nd == 2 else outs[0]
    out_bf = jnp.transpose(layer_in, (1, 0, 2))
    if is_bidirectional:
        feat = jnp.concatenate([out_bf[:, -1, :H], out_bf[:, 0, H:]], axis=1)
    else:
        feat = out_bf[:, -1, :]
    out = jnp.dot(feat, params["w_dec"].T, precision=hp) + params["b_dec"]
    return out, (jnp.stack(hns, axis=0), jnp.stack(cns, axis=0))


# ----------------------------------------------------------------------------
# Deterministic parameter init (PyTorch-style uniform(-1/sqrt(H), 1/sqrt(H)))
# ----------------------------------------------------------------------------
def init_params(key, input_dim, hidden_dim, num_layers, is_bidirectional):
    nd = 2 if is_bidirectional else 1
    bound = 1.0 / jnp.sqrt(jnp.float32(hidden_dim))
    params = {"lstm": []}
    for l in range(num_layers):
        din = input_dim if l == 0 else hidden_dim * nd
        layer = []
        for d in range(nd):
            key, k1, k2, k3, k4 = jax.random.split(key, 5)
            layer.append({
                "w_ih": jax.random.uniform(k1, (4 * hidden_dim, din),
                                           jnp.float32, -bound, bound),
                "w_hh": jax.random.uniform(k2, (4 * hidden_dim, hidden_dim),
                                           jnp.float32, -bound, bound),
                "b_ih": jax.random.uniform(k3, (4 * hidden_dim,),
                                           jnp.float32, -bound, bound),
                "b_hh": jax.random.uniform(k4, (4 * hidden_dim,),
                                           jnp.float32, -bound, bound),
            })
        params["lstm"].append(layer)
    key, k5, k6 = jax.random.split(key, 3)
    fan_in = hidden_dim * nd
    lin_bound = 1.0 / jnp.sqrt(jnp.float32(fan_in))
    params["w_dec"] = jax.random.uniform(k5, (1, fan_in), jnp.float32,
                                         -lin_bound, lin_bound)
    params["b_dec"] = jax.random.uniform(k6, (1,), jnp.float32,
                                         -lin_bound, lin_bound)
    return params


if __name__ == "__main__":
    # Small shapes: batch=2, seq=8, input_dim=16, hidden_dim=32, num_layers=2, bidirectional
    B, T, INPUT_DIM, HIDDEN_DIM, NUM_LAYERS = 2, 8, 16, 32, 2
    IS_BIDIRECTIONAL = True

    key = jax.random.PRNGKey(0)
    key, kx, kp = jax.random.split(key, 3)
    x = jax.random.normal(kx, (B, T, INPUT_DIM), dtype=jnp.float32)
    params = init_params(kp, INPUT_DIM, HIDDEN_DIM, NUM_LAYERS, IS_BIDIRECTIONAL)

    fwd = functools.partial(model_forward, hidden_dim=HIDDEN_DIM,
                            num_layers=NUM_LAYERS,
                            is_bidirectional=IS_BIDIRECTIONAL)
    out, (hn, cn) = jax.jit(fwd)(x, params)
    jax.block_until_ready((out, hn, cn))

    nd = 2 if IS_BIDIRECTIONAL else 1
    assert out.shape == (B, 1)
    assert hn.shape == (NUM_LAYERS * nd, B, HIDDEN_DIM)
    assert cn.shape == (NUM_LAYERS * nd, B, HIDDEN_DIM)

    ref_out, (ref_hn, ref_cn) = reference_forward(
        x, params, HIDDEN_DIM, NUM_LAYERS, IS_BIDIRECTIONAL)
    assert jnp.allclose(out, ref_out, atol=5e-3, rtol=5e-3)
    assert jnp.allclose(hn, ref_hn, atol=5e-3, rtol=5e-3)
    assert jnp.allclose(cn, ref_cn, atol=5e-3, rtol=5e-3)

    print("KERNEL_OK")
</pallas_src>

<mosaic_0001>
module attributes {stable_mosaic.version = 11 : i64} {
  func.func @kernel(%arg0: memref<64x16xf32, #tpu.memory_space<vmem>>, %arg1: memref<16x256xf32, #tpu.memory_space<vmem>>, %arg2: memref<64x256xf32, #tpu.memory_space<vmem>>, %arg3: memref<1x256xf32, #tpu.memory_space<vmem>>, %arg4: memref<64x256xf32, #tpu.memory_space<vmem>>, %arg5: memref<64x256xf32, #tpu.memory_space<vmem>>, %arg6: memref<1x256xf32, #tpu.memory_space<vmem>>, %arg7: memref<1x64xf32, #tpu.memory_space<vmem>>, %arg8: memref<1x1xf32, #tpu.memory_space<vmem>>, %arg9: memref<8x1xf32, #tpu.memory_space<vmem>>, %arg10: memref<2x8x64xf32, #tpu.memory_space<vmem>>, %arg11: memref<2x8x64xf32, #tpu.memory_space<vmem>>, %arg12: memref<64x256xf32, #tpu.memory_space<vmem>>, %arg13: memref<64x256xf32, #tpu.memory_space<vmem>>, %arg14: memref<64x64xf32, #tpu.memory_space<vmem>>) attributes {dimension_semantics = [], scalar_prefetch = 0 : i64, scratch_operands = 3 : i64, tpu.core_type = #tpu.core_type<tc>} {
    %0 = tpu.iota {dimensions = array<i32: 1>} : vector<8x256xi32>
    %c64_i32 = arith.constant 64 : i32
    %c0_i32 = arith.constant 0 : i32
    %1 = arith.cmpi eq, %c64_i32, %c0_i32 : i32
    %c1_i32 = arith.constant 1 : i32
    %2 = arith.select %1, %c1_i32, %c64_i32 : i32
    %3 = vector.broadcast %2 : i32 to vector<8x256xi32>
    %4 = arith.remsi %0, %3 : vector<8x256xi32>
    %c0_i32_0 = arith.constant 0 : i32
    %5 = vector.broadcast %c0_i32_0 : i32 to vector<8x256xi32>
    %6 = arith.cmpi ne, %4, %5 : vector<8x256xi32>
    %c0_i32_1 = arith.constant 0 : i32
    %7 = vector.broadcast %c0_i32_1 : i32 to vector<8x256xi32>
    %8 = arith.cmpi slt, %4, %7 : vector<8x256xi32>
    %c0_i32_2 = arith.constant 0 : i32
    %9 = arith.cmpi slt, %2, %c0_i32_2 : i32
    %10 = vector.broadcast %9 : i1 to vector<8x256xi1>
    %11 = vector.broadcast %10 : vector<8x256xi1> to vector<8x256xi1>
    %12 = arith.xori %8, %11 : vector<8x256xi1>
    %13 = arith.andi %12, %6 : vector<8x256xi1>
    %14 = vector.broadcast %2 : i32 to vector<8x256xi32>
    %15 = arith.addi %4, %14 : vector<8x256xi32>
    %16 = arith.select %13, %15, %4 : vector<8x256xi1>, vector<8x256xi32>
    %c32_i32 = arith.constant 32 : i32
    %17 = vector.broadcast %c32_i32 : i32 to vector<8x256xi32>
    %18 = arith.cmpi slt, %16, %17 : vector<8x256xi32>
    %c0 = arith.constant 0 : index
    %c0_3 = arith.constant 0 : index
    %19 = vector.load %arg0[%c0, %c0_3] : memref<64x16xf32, #tpu.memory_space<vmem>>, vector<64x16xf32>
    %c0_4 = arith.constant 0 : index
    %c0_5 = arith.constant 0 : index
    %20 = vector.load %arg1[%c0_4, %c0_5] : memref<16x256xf32, #tpu.memory_space<vmem>>, vector<16x256xf32>
    %cst = arith.constant dense<0.000000e+00> : vector<64x256xf32>
    %21 = tpu.matmul %19, %20, %cst {dimension_numbers = #tpu.dot_dimension_numbers<[1], [0], [0], [1], [0, 0, 1, 1], [], []>} : vector<64x16xf32>, vector<16x256xf32>, vector<64x256xf32> -> vector<64x256xf32>
    %c0_6 = arith.constant 0 : index
    %c0_7 = arith.constant 0 : index
    %22 = vector.load %arg13[%c0_6, %c0_7] : memref<64x256xf32, #tpu.memory_space<vmem>>, vector<64x256xf32>
    tpu.vector_store %arg13[%c0_6, %c0_7], %21 {strides = array<i32>} : memref<64x256xf32, #tpu.memory_space<vmem>>, vector<64x256xf32>,
    %c0_8 = arith.constant 0 : index
    %c0_9 = arith.constant 0 : index
    %23 = vector.load %arg3[%c0_8, %c0_9] : memref<1x256xf32, #tpu.memory_space<vmem>>, vector<1x256xf32>
    %c0_i32_10 = arith.constant 0 : i32
    %c8_i32 = arith.constant 8 : i32
    %24 = arith.muli %c0_i32_10, %c8_i32 : i32
    %25 = tpu.assume_multiple %24, 8 : i32
    %c7_i32 = arith.constant 7 : i32
    %26 = arith.subi %c7_i32, %c0_i32_10 : i32
    %c8_i32_11 = arith.constant 8 : i32
    %27 = arith.muli %26, %c8_i32_11 : i32
    %28 = tpu.assume_multiple %27, 8 : i32
    %29 = arith.index_cast %25 : i32 to index
    %c0_12 = arith.constant 0 : index
    %30 = vector.load %arg13[%29, %c0_12] : memref<64x256xf32, #tpu.memory_space<vmem>>, vector<8x256xf32>
    %31 = arith.index_cast %28 : i32 to index
    %c0_13 = arith.constant 0 : index
    %32 = vector.load %arg13[%31, %c0_13] : memref<64x256xf32, #tpu.memory_space<vmem>>, vector<8x256xf32>
    %33 = arith.select %18, %30, %32 : vector<8x256xi1>, vector<8x256xf32>
    %34 = vector.broadcast %23 : vector<1x256xf32> to vector<8x256xf32>
    %35 = arith.addf %33, %34 : vector<8x256xf32>
    %36 = arith.index_cast %25 : i32 to index
    %c0_14 = arith.constant 0 : index
    %37 = vector.load %arg12[%36, %c0_14] : memref<64x256xf32, #tpu.memory_space<vmem>>, vector<8x256xf32>
    tpu.vector_store %arg12[%36, %c0_14], %35 {strides = array<i32>} : memref<64x256xf32, #tpu.memory_space<vmem>>, vector<8x256xf32>,
    %c1_i32_15 = arith.constant 1 : i32
    %c8_i32_16 = arith.constant 8 : i32
    %38 = arith.muli %c1_i32_15, %c8_i32_16 : i32
    %39 = tpu.assume_multiple %38, 8 : i32
    %c7_i32_17 = arith.constant 7 : i32
    %40 = arith.subi %c7_i32_17, %c1_i32_15 : i32
    %c8_i32_18 = arith.constant 8 : i32
    %41 = arith.muli %40, %c8_i32_18 : i32
    %42 = tpu.assume_multiple %41, 8 : i32
    %43 = arith.index_cast %39 : i32 to index
    %c0_19 = arith.constant 0 : index
    %44 = vector.load %arg13[%43, %c0_19] : memref<64x256xf32, #tpu.memory_space<vmem>>, vector<8x256xf32>
    %45 = arith.index_cast %42 : i32 to index
    %c0_20 = arith.constant 0 : index
    %46 = vector.load %arg13[%45, %c0_20] : memref<64x256xf32, #tpu.memory_space<vmem>>, vector<8x256xf32>
    %47 = arith.select %18, %44, %46 : vector<8x256xi1>, vector<8x256xf32>
    %48 = vector.broadcast %23 : vector<1x256xf32> to vector<8x256xf32>
    %49 = arith.addf %47, %48 : vector<8x256xf32>
    %50 = arith.index_cast %39 : i32 to index
    %c0_21 = arith.constant 0 : index
    %51 = vector.load %arg12[%50, %c0_21] : memref<64x256xf32, #tpu.memory_space<vmem>>, vector<8x256xf32>
    tpu.vector_store %arg12[%50, %c0_21], %49 {strides = array<i32>} : memref<64x256xf32, #tpu.memory_space<vmem>>, vector<8x256xf32>,
    %c2_i32 = arith.constant 2 : i32
    %c8_i32_22 = arith.constant 8 : i32
    %52 = arith.muli %c2_i32, %c8_i32_22 : i32
    %53 = tpu.assume_multiple %52, 8 : i32
    %c7_i32_23 = arith.constant 7 : i32
    %54 = arith.subi %c7_i32_23, %c2_i32 : i32
    %c8_i32_24 = arith.constant 8 : i32
    %55 = arith.muli %54, %c8_i32_24 : i32
    %56 = tpu.assume_multiple %55, 8 : i32
    %57 = arith.index_cast %53 : i32 to index
    %c0_25 = arith.constant 0 : index
    %58 = vector.load %arg13[%57, %c0_25] : memref<64x256xf32, #tpu.memory_space<vmem>>, vector<8x256xf32>
    %59 = arith.index_cast %56 : i32 to index
    %c0_26 = arith.constant 0 : index
    %60 = vector.load %arg13[%59, %c0_26] : memref<64x256xf32, #tpu.memory_space<vmem>>, vector<8x256xf32>
    %61 = arith.select %18, %58, %60 : vector<8x256xi1>, vector<8x256xf32>
    %62 = vector.broadcast %23 : vector<1x256xf32> to vector<8x256xf32>
    %63 = arith.addf %61, %62 : vector<8x256xf32>
    %64 = arith.index_cast %53 : i32 to index
    %c0_27 = arith.constant 0 : index
    %65 = vector.load %arg12[%64, %c0_27] : memref<64x256xf32, #tpu.memory_space<vmem>>, vector<8x256xf32>
    tpu.vector_store %arg12[%64, %c0_27], %63 {strides = array<i32>} : memref<64x256xf32, #tpu.memory_space<vmem>>, vector<8x256xf32>,
    %c3_i32 = arith.constant 3 : i32
    %c8_i32_28 = arith.constant 8 : i32
    %66 = arith.muli %c3_i32, %c8_i32_28 : i32
    %67 = tpu.assume_multiple %66, 8 : i32
    %c7_i32_29 = arith.constant 7 : i32
    %68 = arith.subi %c7_i32_29, %c3_i32 : i32
    %c8_i32_30 = arith.constant 8 : i32
    %69 = arith.muli %68, %c8_i32_30 : i32
    %70 = tpu.assume_multiple %69, 8 : i32
    %71 = arith.index_cast %67 : i32 to index
    %c0_31 = arith.constant 0 : index
    %72 = vector.load %arg13[%71, %c0_31] : memref<64x256xf32, #tpu.memory_space<vmem>>, vector<8x256xf32>
    %73 = arith.index_cast %70 : i32 to index
    %c0_32 = arith.constant 0 : index
    %74 = vector.load %arg13[%73, %c0_32] : memref<64x256xf32, #tpu.memory_space<vmem>>, vector<8x256xf32>
    %75 = arith.select %18, %72, %74 : vector<8x256xi1>, vector<8x256xf32>
    %76 = vector.broadcast %23 : vector<1x256xf32> to vector<8x256xf32>
    %77 = arith.addf %75, %76 : vector<8x256xf32>
    %78 = arith.index_cast %67 : i32 to index
    %c0_33 = arith.constant 0 : index
    %79 = vector.load %arg12[%78, %c0_33] : memref<64x256xf32, #tpu.memory_space<vmem>>, vector<8x256xf32>
    tpu.vector_store %arg12[%78, %c0_33], %77 {strides = array<i32>} : memref<64x256xf32, #tpu.memory_space<vmem>>, vector<8x256xf32>,
    %c4_i32 = arith.constant 4 : i32
    %c8_i32_34 = arith.constant 8 : i32
    %80 = arith.muli %c4_i32, %c8_i32_34 : i32
    %81 = tpu.assume_multiple %80, 8 : i32
    %c7_i32_35 = arith.constant 7 : i32
    %82 = arith.subi %c7_i32_35, %c4_i32 : i32
    %c8_i32_36 = arith.constant 8 : i32
    %83 = arith.muli %82, %c8_i32_36 : i32
    %84 = tpu.assume_multiple %83, 8 : i32
    %85 = arith.index_cast %81 : i32 to index
    %c0_37 = arith.constant 0 : index
    %86 = vector.load %arg13[%85, %c0_37] : memref<64x256xf32, #tpu.memory_space<vmem>>, vector<8x256xf32>
    %87 = arith.index_cast %84 : i32 to index
    %c0_38 = arith.constant 0 : index
    %88 = vector.load %arg13[%87, %c0_38] : memref<64x256xf32, #tpu.memory_space<vmem>>, vector<8x256xf32>
    %89 = arith.select %18, %86, %88 : vector<8x256xi1>, vector<8x256xf32>
    %90 = vector.broadcast %23 : vector<1x256xf32> to vector<8x256xf32>
    %91 = arith.addf %89, %90 : vector<8x256xf32>
    %92 = arith.index_cast %81 : i32 to index
    %c0_39 = arith.constant 0 : index
    %93 = vector.load %arg12[%92, %c0_39] : memref<64x256xf32, #tpu.memory_space<vmem>>, vector<8x256xf32>
    tpu.vector_store %arg12[%92, %c0_39], %91 {strides = array<i32>} : memref<64x256xf32, #tpu.memory_space<vmem>>, vector<8x256xf32>,
    %c5_i32 = arith.constant 5 : i32
    %c8_i32_40 = arith.constant 8 : i32
    %94 = arith.muli %c5_i32, %c8_i32_40 : i32
    %95 = tpu.assume_multiple %94, 8 : i32
    %c7_i32_41 = arith.constant 7 : i32
    %96 = arith.subi %c7_i32_41, %c5_i32 : i32
    %c8_i32_42 = arith.constant 8 : i32
    %97 = arith.muli %96, %c8_i32_42 : i32
    %98 = tpu.assume_multiple %97, 8 : i32
    %99 = arith.index_cast %95 : i32 to index
    %c0_43 = arith.constant 0 : index
    %100 = vector.load %arg13[%99, %c0_43] : memref<64x256xf32, #tpu.memory_space<vmem>>, vector<8x256xf32>
    %101 = arith.index_cast %98 : i32 to index
    %c0_44 = arith.constant 0 : index
    %102 = vector.load %arg13[%101, %c0_44] : memref<64x256xf32, #tpu.memory_space<vmem>>, vector<8x256xf32>
    %103 = arith.select %18, %100, %102 : vector<8x256xi1>, vector<8x256xf32>
    %104 = vector.broadcast %23 : vector<1x256xf32> to vector<8x256xf32>
    %105 = arith.addf %103, %104 : vector<8x256xf32>
    %106 = arith.index_cast %95 : i32 to index
    %c0_45 = arith.constant 0 : index
    %107 = vector.load %arg12[%106, %c0_45] : memref<64x256xf32, #tpu.memory_space<vmem>>, vector<8x256xf32>
    tpu.vector_store %arg12[%106, %c0_45], %105 {strides = array<i32>} : memref<64x256xf32, #tpu.memory_space<vmem>>, vector<8x256xf32>,
    %c6_i32 = arith.constant 6 : i32
    %c8_i32_46 = arith.constant 8 : i32
    %108 = arith.muli %c6_i32, %c8_i32_46 : i32
    %109 = tpu.assume_multiple %108, 8 : i32
    %c7_i32_47 = arith.constant 7 : i32
    %110 = arith.subi %c7_i32_47, %c6_i32 : i32
    %c8_i32_48 = arith.constant 8 : i32
    %111 = arith.muli %110, %c8_i32_48 : i32
    %112 = tpu.assume_multiple %111, 8 : i32
    %113 = arith.index_cast %109 : i32 to index
    %c0_49 = arith.constant 0 : index
    %114 = vector.load %arg13[%113, %c0_49] : memref<64x256xf32, #tpu.memory_space<vmem>>, vector<8x256xf32>
    %115 = arith.index_cast %112 : i32 to index
    %c0_50 = arith.constant 0 : index
    %116 = vector.load %arg13[%115, %c0_50] : memref<64x256xf32, #tpu.memory_space<vmem>>, vector<8x256xf32>
    %117 = arith.select %18, %114, %116 : vector<8x256xi1>, vector<8x256xf32>
    %118 = vector.broadcast %23 : vector<1x256xf32> to vector<8x256xf32>
    %119 = arith.addf %117, %118 : vector<8x256xf32>
    %120 = arith.index_cast %109 : i32 to index
    %c0_51 = arith.constant 0 : index
    %121 = vector.load %arg12[%120, %c0_51] : memref<64x256xf32, #tpu.memory_space<vmem>>, vector<8x256xf32>
    tpu.vector_store %arg12[%120, %c0_51], %119 {strides = array<i32>} : memref<64x256xf32, #tpu.memory_space<vmem>>, vector<8x256xf32>,
    %c7_i32_52 = arith.constant 7 : i32
    %c8_i32_53 = arith.constant 8 : i32
    %122 = arith.muli %c7_i32_52, %c8_i32_53 : i32
    %123 = tpu.assume_multiple %122, 8 : i32
    %c7_i32_54 = arith.constant 7 : i32
    %124 = arith.subi %c7_i32_54, %c7_i32_52 : i32
    %c8_i32_55 = arith.constant 8 : i32
    %125 = arith.muli %124, %c8_i32_55 : i32
    %126 = tpu.assume_multiple %125, 8 : i32
    %127 = arith.index_cast %123 : i32 to index
    %c0_56 = arith.constant 0 : index
    %128 = vector.load %arg13[%127, %c0_56] : memref<64x256xf32, #tpu.memory_space<vmem>>, vector<8x256xf32>
    %129 = arith.index_cast %126 : i32 to index
    %c0_57 = arith.constant 0 : index
    %130 = vector.load %arg13[%129, %c0_57] : memref<64x256xf32, #tpu.memory_space<vmem>>, vector<8x256xf32>
    %131 = arith.select %18, %128, %130 : vector<8x256xi1>, vector<8x256xf32>
    %132 = vector.broadcast %23 : vector<1x256xf32> to vector<8x256xf32>
    %133 = arith.addf %131, %132 : vector<8x256xf32>
    %134 = arith.index_cast %123 : i32 to index
    %c0_58 = arith.constant 0 : index
    %135 = vector.load %arg12[%134, %c0_58] : memref<64x256xf32, #tpu.memory_space<vmem>>, vector<8x256xf32>
    tpu.vector_store %arg12[%134, %c0_58], %133 {strides = array<i32>} : memref<64x256xf32, #tpu.memory_space<vmem>>, vector<8x256xf32>,
    %c8_i32_59 = arith.constant 8 : i32
    %c0_60 = arith.constant 0 : index
    %c0_61 = arith.constant 0 : index
    %136 = vector.load %arg2[%c0_60, %c0_61] : memref<64x256xf32, #tpu.memory_space<vmem>>, vector<64x256xf32>
    %cst_62 = arith.constant 0.000000e+00 : f32
    %137 = vector.broadcast %cst_62 : f32 to vector<8x64xf32>
    %cst_63 = arith.constant 0.000000e+00 : f32
    %138 = vector.broadcast %cst_63 : f32 to vector<8x64xf32>
    %c0_i32_64 = arith.constant 0 : i32
    %c8_i32_65 = arith.constant 8 : i32
    %139 = arith.muli %c0_i32_64, %c8_i32_65 : i32
    %140 = tpu.assume_multiple %139, 8 : i32
    %cst_66 = arith.constant dense<0.000000e+00> : vector<8x256xf32>
    %141 = tpu.matmul %137, %136, %cst_66 {dimension_numbers = #tpu.dot_dimension_numbers<[1], [0], [0], [1], [0, 0, 1, 1], [], []>} : vector<8x64xf32>, vector<64x256xf32>, vector<8x256xf32> -> vector<8x256xf32>
    %142 = arith.index_cast %140 : i32 to index
    %c0_67 = arith.constant 0 : index
    %143 = vector.load %arg12[%142, %c0_67] : memref<64x256xf32, #tpu.memory_space<vmem>>, vector<8x256xf32>
    %144 = arith.addf %141, %143 : vector<8x256xf32>
    %145 = vector.extract_strided_slice %144 {offsets = [0, 0], sizes = [8, 192], strides = [1, 1]} : vector<8x256xf32> to vector<8x192xf32>
    %146 = arith.negf %145 : vector<8x192xf32>
    %147 = math.exp %146 : vector<8x192xf32>
    %cst_68 = arith.constant 1.000000e+00 : f32
    %148 = vector.broadcast %cst_68 : f32 to vector<8x192xf32>
    %149 = arith.addf %148, %147 : vector<8x192xf32>
    %150 = arith.divf %148, %149 : vector<8x192xf32>
    %151 = vector.extract_strided_slice %144 {offsets = [0, 192], sizes = [8, 64], strides = [1, 1]} : vector<8x256xf32> to vector<8x64xf32>
    %152 = math.tanh %151 : vector<8x64xf32>
    %153 = vector.extract_strided_slice %150 {offsets = [0, 0], sizes = [8, 64], strides = [1, 1]} : vector<8x192xf32> to vector<8x64xf32>
    %154 = vector.extract_strided_slice %150 {offsets = [0, 64], sizes = [8, 64], strides = [1, 1]} : vector<8x192xf32> to vector<8x64xf32>
    %155 = vector.extract_strided_slice %150 {offsets = [0, 128], sizes = [8, 64], strides = [1, 1]} : vector<8x192xf32> to vector<8x64xf32>
    %156 = arith.mulf %154, %138 : vector<8x64xf32>
    %157 = arith.mulf %153, %152 : vector<8x64xf32>
    %158 = arith.addf %156, %157 : vector<8x64xf32>
    %159 = math.tanh %158 : vector<8x64xf32>
    %160 = arith.mulf %155, %159 : vector<8x64xf32>
    %c7_i32_69 = arith.constant 7 : i32
    %161 = arith.subi %c7_i32_69, %c0_i32_64 : i32
    %c8_i32_70 = arith.constant 8 : i32
    %162 = arith.muli %161, %c8_i32_70 : i32
    %163 = tpu.assume_multiple %162, 8 : i32
    %164 = vector.extract_strided_slice %160 {offsets = [0, 0], sizes = [8, 32], strides = [1, 1]} : vector<8x64xf32> to vector<8x32xf32>
    %165 = arith.index_cast %140 : i32 to index
    %c0_71 = arith.constant 0 : index
    %166 = vector.load %arg14[%165, %c0_71] : memref<64x64xf32, #tpu.memory_space<vmem>>, vector<8x32xf32>
    tpu.vector_store %arg14[%165, %c0_71], %164 {strides = array<i32>} : memref<64x64xf32, #tpu.memory_space<vmem>>, vector<8x32xf32>,
    %167 = vector.extract_strided_slice %160 {offsets = [0, 32], sizes = [8, 32], strides = [1, 1]} : vector<8x64xf32> to vector<8x32xf32>
    %168 = arith.index_cast %163 : i32 to index
    %c32 = arith.constant 32 : index
    %169 = vector.load %arg14[%168, %c32] : memref<64x64xf32, #tpu.memory_space<vmem>>, vector<8x32xf32>
    tpu.vector_store %arg14[%168, %c32], %167 {strides = array<i32>} : memref<64x64xf32, #tpu.memory_space<vmem>>, vector<8x32xf32>,
    %c1_i32_72 = arith.constant 1 : i32
    %c8_i32_73 = arith.constant 8 : i32
    %170 = arith.muli %c1_i32_72, %c8_i32_73 : i32
    %171 = tpu.assume_multiple %170, 8 : i32
    %cst_74 = arith.constant dense<0.000000e+00> : vector<8x256xf32>
    %172 = tpu.matmul %160, %136, %cst_74 {dimension_numbers = #tpu.dot_dimension_numbers<[1], [0], [0], [1], [0, 0, 1, 1], [], []>} : vector<8x64xf32>, vector<64x256xf32>, vector<8x256xf32> -> vector<8x256xf32>
    %173 = arith.index_cast %171 : i32 to index
    %c0_75 = arith.constant 0 : index
    %174 = vector.load %arg12[%173, %c0_75] : memref<64x256xf32, #tpu.memory_space<vmem>>, vector<8x256xf32>
    %175 = arith.addf %172, %174 : vector<8x256xf32>
    %176 = vector.extract_strided_slice %175 {offsets = [0, 0], sizes = [8, 192], strides = [1, 1]} : vector<8x256xf32> to vector<8x192xf32>
    %177 = arith.negf %176 : vector<8x192xf32>
    %178 = math.exp %177 : vector<8x192xf32>
    %cst_76 = arith.constant 1.000000e+00 : f32
    %179 = vector.broadcast %cst_76 : f32 to vector<8x192xf32>
    %180 = arith.addf %179, %178 : vector<8x192xf32>
    %181 = arith.divf %179, %180 : vector<8x192xf32>
    %182 = vector.extract_strided_slice %175 {offsets = [0, 192], sizes = [8, 64], strides = [1, 1]} : vector<8x256xf32> to vector<8x64xf32>
    %183 = math.tanh %182 : vector<8x64xf32>
    %184 = vector.extract_strided_slice %181 {offsets = [0, 0], sizes = [8, 64], strides = [1, 1]} : vector<8x192xf32> to vector<8x64xf32>
    %185 = vector.extract_strided_slice %181 {offsets = [0, 64], sizes = [8, 64], strides = [1, 1]} : vector<8x192xf32> to vector<8x64xf32>
    %186 = vector.extract_strided_slice %181 {offsets = [0, 128], sizes = [8, 64], strides = [1, 1]} : vector<8x192xf32> to vector<8x64xf32>
    %187 = arith.mulf %185, %158 : vector<8x64xf32>
    %188 = arith.mulf %184, %183 : vector<8x64xf32>
    %189 = arith.addf %187, %188 : vector<8x64xf32>
    %190 = math.tanh %189 : vector<8x64xf32>
    %191 = arith.mulf %186, %190 : vector<8x64xf32>
    %c7_i32_77 = arith.constant 7 : i32
    %192 = arith.subi %c7_i32_77, %c1_i32_72 : i32
    %c8_i32_78 = arith.constant 8 : i32
    %193 = arith.muli %192, %c8_i32_78 : i32
    %194 = tpu.assume_multiple %193, 8 : i32
    %195 = vector.extract_strided_slice %191 {offsets = [0, 0], sizes = [8, 32], strides = [1, 1]} : vector<8x64xf32> to vector<8x32xf32>
    %196 = arith.index_cast %171 : i32 to index
    %c0_79 = arith.constant 0 : index
    %197 = vector.load %arg14[%196, %c0_79] : memref<64x64xf32, #tpu.memory_space<vmem>>, vector<8x32xf32>
    tpu.vector_store %arg14[%196, %c0_79], %195 {strides = array<i32>} : memref<64x64xf32, #tpu.memory_space<vmem>>, vector<8x32xf32>,
    %198 = vector.extract_strided_slice %191 {offsets = [0, 32], sizes = [8, 32], strides = [1, 1]} : vector<8x64xf32> to vector<8x32xf32>
    %199 = arith.index_cast %194 : i32 to index
    %c32_80 = arith.constant 32 : index
    %200 = vector.load %arg14[%199, %c32_80] : memref<64x64xf32, #tpu.memory_space<vmem>>, vector<8x32xf32>
    tpu.vector_store %arg14[%199, %c32_80], %198 {strides = array<i32>} : memref<64x64xf32, #tpu.memory_space<vmem>>, vector<8x32xf32>,
    %c2_i32_81 = arith.constant 2 : i32
    %c8_i32_82 = arith.constant 8 : i32
    %201 = arith.muli %c2_i32_81, %c8_i32_82 : i32
    %202 = tpu.assume_multiple %201, 8 : i32
    %cst_83 = arith.constant dense<0.000000e+00> : vector<8x256xf32>
    %203 = tpu.matmul %191, %136, %cst_83 {dimension_numbers = #tpu.dot_dimension_numbers<[1], [0], [0], [1], [0, 0, 1, 1], [], []>} : vector<8x64xf32>, vector<64x256xf32>, vector<8x256xf32> -> vector<8x256xf32>
    %204 = arith.index_cast %202 : i32 to index
    %c0_84 = arith.constant 0 : index
    %205 = vector.load %arg12[%204, %c0_84] : memref<64x256xf32, #tpu.memory_space<vmem>>, vector<8x256xf32>
    %206 = arith.addf %203, %205 : vector<8x256xf32>
    %207 = vector.extract_strided_slice %206 {offsets = [0, 0], sizes = [8, 192], strides = [1, 1]} : vector<8x256xf32> to vector<8x192xf32>
    %208 = arith.negf %207 : vector<8x192xf32>
    %209 = math.exp %208 : vector<8x192xf32>
    %cst_85 = arith.constant 1.000000e+00 : f32
    %210 = vector.broadcast %cst_85 : f32 to vector<8x192xf32>
    %211 = arith.addf %210, %209 : vector<8x192xf32>
    %212 = arith.divf %210, %211 : vector<8x192xf32>
    %213 = vector.extract_strided_slice %206 {offsets = [0, 192], sizes = [8, 64], strides = [1, 1]} : vector<8x256xf32> to vector<8x64xf32>
    %214 = math.tanh %213 : vector<8x64xf32>
    %215 = vector.extract_strided_slice %212 {offsets = [0, 0], sizes = [8, 64], strides = [1, 1]} : vector<8x192xf32> to vector<8x64xf32>
    %216 = vector.extract_strided_slice %212 {offsets = [0, 64], sizes = [8, 64], strides = [1, 1]} : vector<8x192xf32> to vector<8x64xf32>
    %217 = vector.extract_strided_slice %212 {offsets = [0, 128], sizes = [8, 64], strides = [1, 1]} : vector<8x192xf32> to vector<8x64xf32>
    %218 = arith.mulf %216, %189 : vector<8x64xf32>
    %219 = arith.mulf %215, %214 : vector<8x64xf32>
    %220 = arith.addf %218, %219 : vector<8x64xf32>
    %221 = math.tanh %220 : vector<8x64xf32>
    %222 = arith.mulf %217, %221 : vector<8x64xf32>
    %c7_i32_86 = arith.constant 7 : i32
    %223 = arith.subi %c7_i32_86, %c2_i32_81 : i32
    %c8_i32_87 = arith.constant 8 : i32
    %224 = arith.muli %223, %c8_i32_87 : i32
    %225 = tpu.assume_multiple %224, 8 : i32
    %226 = vector.extract_strided_slice %222 {offsets = [0, 0], sizes = [8, 32], strides = [1, 1]} : vector<8x64xf32> to vector<8x32xf32>
    %227 = arith.index_cast %202 : i32 to index
    %c0_88 = arith.constant 0 : index
    %228 = vector.load %arg14[%227, %c0_88] : memref<64x64xf32, #tpu.memory_space<vmem>>, vector<8x32xf32>
    tpu.vector_store %arg14[%227, %c0_88], %226 {strides = array<i32>} : memref<64x64xf32, #tpu.memory_space<vmem>>, vector<8x32xf32>,
    %229 = vector.extract_strided_slice %222 {offsets = [0, 32], sizes = [8, 32], strides = [1, 1]} : vector<8x64xf32> to vector<8x32xf32>
    %230 = arith.index_cast %225 : i32 to index
    %c32_89 = arith.constant 32 : index
    %231 = vector.load %arg14[%230, %c32_89] : memref<64x64xf32, #tpu.memory_space<vmem>>, vector<8x32xf32>
    tpu.vector_store %arg14[%230, %c32_89], %229 {strides = array<i32>} : memref<64x64xf32, #tpu.memory_space<vmem>>, vector<8x32xf32>,
    %c3_i32_90 = arith.constant 3 : i32
    %c8_i32_91 = arith.constant 8 : i32
    %232 = arith.muli %c3_i32_90, %c8_i32_91 : i32
    %233 = tpu.assume_multiple %232, 8 : i32
    %cst_92 = arith.constant dense<0.000000e+00> : vector<8x256xf32>
    %234 = tpu.matmul %222, %136, %cst_92 {dimension_numbers = #tpu.dot_dimension_numbers<[1], [0], [0], [1], [0, 0, 1, 1], [], []>} : vector<8x64xf32>, vector<64x256xf32>, vector<8x256xf32> -> vector<8x256xf32>
    %235 = arith.index_cast %233 : i32 to index
    %c0_93 = arith.constant 0 : index
    %236 = vector.load %arg12[%235, %c0_93] : memref<64x256xf32, #tpu.memory_space<vmem>>, vector<8x256xf32>
    %237 = arith.addf %234, %236 : vector<8x256xf32>
    %238 = vector.extract_strided_slice %237 {offsets = [0, 0], sizes = [8, 192], strides = [1, 1]} : vector<8x256xf32> to vector<8x192xf32>
    %239 = arith.negf %238 : vector<8x192xf32>
    %240 = math.exp %239 : vector<8x192xf32>
    %cst_94 = arith.constant 1.000000e+00 : f32
    %241 = vector.broadcast %cst_94 : f32 to vector<8x192xf32>
    %242 = arith.addf %241, %240 : vector<8x192xf32>
    %243 = arith.divf %241, %242 : vector<8x192xf32>
    %244 = vector.extract_strided_slice %237 {offsets = [0, 192], sizes = [8, 64], strides = [1, 1]} : vector<8x256xf32> to vector<8x64xf32>
    %245 = math.tanh %244 : vector<8x64xf32>
    %246 = vector.extract_strided_slice %243 {offsets = [0, 0], sizes = [8, 64], strides = [1, 1]} : vector<8x192xf32> to vector<8x64xf32>
    %247 = vector.extract_strided_slice %243 {offsets = [0, 64], sizes = [8, 64], strides = [1, 1]} : vector<8x192xf32> to vector<8x64xf32>
    %248 = vector.extract_strided_slice %243 {offsets = [0, 128], sizes = [8, 64], strides = [1, 1]} : vector<8x192xf32> to vector<8x64xf32>
    %249 = arith.mulf %247, %220 : vector<8x64xf32>
    %250 = arith.mulf %246, %245 : vector<8x64xf32>
    %251 = arith.addf %249, %250 : vector<8x64xf32>
    %252 = math.tanh %251 : vector<8x64xf32>
    %253 = arith.mulf %248, %252 : vector<8x64xf32>
    %c7_i32_95 = arith.constant 7 : i32
    %254 = arith.subi %c7_i32_95, %c3_i32_90 : i32
    %c8_i32_96 = arith.constant 8 : i32
    %255 = arith.muli %254, %c8_i32_96 : i32
    %256 = tpu.assume_multiple %255, 8 : i32
    %257 = vector.extract_strided_slice %253 {offsets = [0, 0], sizes = [8, 32], strides = [1, 1]} : vector<8x64xf32> to vector<8x32xf32>
    %258 = arith.index_cast %233 : i32 to index
    %c0_97 = arith.constant 0 : index
    %259 = vector.load %arg14[%258, %c0_97] : memref<64x64xf32, #tpu.memory_space<vmem>>, vector<8x32xf32>
    tpu.vector_store %arg14[%258, %c0_97], %257 {strides = array<i32>} : memref<64x64xf32, #tpu.memory_space<vmem>>, vector<8x32xf32>,
    %260 = vector.extract_strided_slice %253 {offsets = [0, 32], sizes = [8, 32], strides = [1, 1]} : vector<8x64xf32> to vector<8x32xf32>
    %261 = arith.index_cast %256 : i32 to index
    %c32_98 = arith.constant 32 : index
    %262 = vector.load %arg14[%261, %c32_98] : memref<64x64xf32, #tpu.memory_space<vmem>>, vector<8x32xf32>
    tpu.vector_store %arg14[%261, %c32_98], %260 {strides = array<i32>} : memref<64x64xf32, #tpu.memory_space<vmem>>, vector<8x32xf32>,
    %c4_i32_99 = arith.constant 4 : i32
    %c8_i32_100 = arith.constant 8 : i32
    %263 = arith.muli %c4_i32_99, %c8_i32_100 : i32
    %264 = tpu.assume_multiple %263, 8 : i32
    %cst_101 = arith.constant dense<0.000000e+00> : vector<8x256xf32>
    %265 = tpu.matmul %253, %136, %cst_101 {dimension_numbers = #tpu.dot_dimension_numbers<[1], [0], [0], [1], [0, 0, 1, 1], [], []>} : vector<8x64xf32>, vector<64x256xf32>, vector<8x256xf32> -> vector<8x256xf32>
    %266 = arith.index_cast %264 : i32 to index
    %c0_102 = arith.constant 0 : index
    %267 = vector.load %arg12[%266, %c0_102] : memref<64x256xf32, #tpu.memory_space<vmem>>, vector<8x256xf32>
    %268 = arith.addf %265, %267 : vector<8x256xf32>
    %269 = vector.extract_strided_slice %268 {offsets = [0, 0], sizes = [8, 192], strides = [1, 1]} : vector<8x256xf32> to vector<8x192xf32>
    %270 = arith.negf %269 : vector<8x192xf32>
    %271 = math.exp %270 : vector<8x192xf32>
    %cst_103 = arith.constant 1.000000e+00 : f32
    %272 = vector.broadcast %cst_103 : f32 to vector<8x192xf32>
    %273 = arith.addf %272, %271 : vector<8x192xf32>
    %274 = arith.divf %272, %273 : vector<8x192xf32>
    %275 = vector.extract_strided_slice %268 {offsets = [0, 192], sizes = [8, 64], strides = [1, 1]} : vector<8x256xf32> to vector<8x64xf32>
    %276 = math.tanh %275 : vector<8x64xf32>
    %277 = vector.extract_strided_slice %274 {offsets = [0, 0], sizes = [8, 64], strides = [1, 1]} : vector<8x192xf32> to vector<8x64xf32>
    %278 = vector.extract_strided_slice %274 {offsets = [0, 64], sizes = [8, 64], strides = [1, 1]} : vector<8x192xf32> to vector<8x64xf32>
    %279 = vector.extract_strided_slice %274 {offsets = [0, 128], sizes = [8, 64], strides = [1, 1]} : vector<8x192xf32> to vector<8x64xf32>
    %280 = arith.mulf %278, %251 : vector<8x64xf32>
    %281 = arith.mulf %277, %276 : vector<8x64xf32>
    %282 = arith.addf %280, %281 : vector<8x64xf32>
    %283 = math.tanh %282 : vector<8x64xf32>
    %284 = arith.mulf %279, %283 : vector<8x64xf32>
    %c7_i32_104 = arith.constant 7 : i32
    %285 = arith.subi %c7_i32_104, %c4_i32_99 : i32
    %c8_i32_105 = arith.constant 8 : i32
    %286 = arith.muli %285, %c8_i32_105 : i32
    %287 = tpu.assume_multiple %286, 8 : i32
    %288 = vector.extract_strided_slice %284 {offsets = [0, 0], sizes = [8, 32], strides = [1, 1]} : vector<8x64xf32> to vector<8x32xf32>
    %289 = arith.index_cast %264 : i32 to index
    %c0_106 = arith.constant 0 : index
    %290 = vector.load %arg14[%289, %c0_106] : memref<64x64xf32, #tpu.memory_space<vmem>>, vector<8x32xf32>
    tpu.vector_store %arg14[%289, %c0_106], %288 {strides = array<i32>} : memref<64x64xf32, #tpu.memory_space<vmem>>, vector<8x32xf32>,
    %291 = vector.extract_strided_slice %284 {offsets = [0, 32], sizes = [8, 32], strides = [1, 1]} : vector<8x64xf32> to vector<8x32xf32>
    %292 = arith.index_cast %287 : i32 to index
    %c32_107 = arith.constant 32 : index
    %293 = vector.load %arg14[%292, %c32_107] : memref<64x64xf32, #tpu.memory_space<vmem>>, vector<8x32xf32>
    tpu.vector_store %arg14[%292, %c32_107], %291 {strides = array<i32>} : memref<64x64xf32, #tpu.memory_space<vmem>>, vector<8x32xf32>,
    %c5_i32_108 = arith.constant 5 : i32
    %c8_i32_109 = arith.constant 8 : i32
    %294 = arith.muli %c5_i32_108, %c8_i32_109 : i32
    %295 = tpu.assume_multiple %294, 8 : i32
    %cst_110 = arith.constant dense<0.000000e+00> : vector<8x256xf32>
    %296 = tpu.matmul %284, %136, %cst_110 {dimension_numbers = #tpu.dot_dimension_numbers<[1], [0], [0], [1], [0, 0, 1, 1], [], []>} : vector<8x64xf32>, vector<64x256xf32>, vector<8x256xf32> -> vector<8x256xf32>
    %297 = arith.index_cast %295 : i32 to index
    %c0_111 = arith.constant 0 : index
    %298 = vector.load %arg12[%297, %c0_111] : memref<64x256xf32, #tpu.memory_space<vmem>>, vector<8x256xf32>
    %299 = arith.addf %296, %298 : vector<8x256xf32>
    %300 = vector.extract_strided_slice %299 {offsets = [0, 0], sizes = [8, 192], strides = [1, 1]} : vector<8x256xf32> to vector<8x192xf32>
    %301 = arith.negf %300 : vector<8x192xf32>
    %302 = math.exp %301 : vector<8x192xf32>
    %cst_112 = arith.constant 1.000000e+00 : f32
    %303 = vector.broadcast %cst_112 : f32 to vector<8x192xf32>
    %304 = arith.addf %303, %302 : vector<8x192xf32>
    %305 = arith.divf %303, %304 : vector<8x192xf32>
    %306 = vector.extract_strided_slice %299 {offsets = [0, 192], sizes = [8, 64], strides = [1, 1]} : vector<8x256xf32> to vector<8x64xf32>
    %307 = math.tanh %306 : vector<8x64xf32>
    %308 = vector.extract_strided_slice %305 {offsets = [0, 0], sizes = [8, 64], strides = [1, 1]} : vector<8x192xf32> to vector<8x64xf32>
    %309 = vector.extract_strided_slice %305 {offsets = [0, 64], sizes = [8, 64], strides = [1, 1]} : vector<8x192xf32> to vector<8x64xf32>
    %310 = vector.extract_strided_slice %305 {offsets = [0, 128], sizes = [8, 64], strides = [1, 1]} : vector<8x192xf32> to vector<8x64xf32>
    %311 = arith.mulf %309, %282 : vector<8x64xf32>
    %312 = arith.mulf %308, %307 : vector<8x64xf32>
    %313 = arith.addf %311, %312 : vector<8x64xf32>
    %314 = math.tanh %313 : vector<8x64xf32>
    %315 = arith.mulf %310, %314 : vector<8x64xf32>
    %c7_i32_113 = arith.constant 7 : i32
    %316 = arith.subi %c7_i32_113, %c5_i32_108 : i32
    %c8_i32_114 = arith.constant 8 : i32
    %317 = arith.muli %316, %c8_i32_114 : i32
    %318 = tpu.assume_multiple %317, 8 : i32
    %319 = vector.extract_strided_slice %315 {offsets = [0, 0], sizes = [8, 32], strides = [1, 1]} : vector<8x64xf32> to vector<8x32xf32>
    %320 = arith.index_cast %295 : i32 to index
    %c0_115 = arith.constant 0 : index
    %321 = vector.load %arg14[%320, %c0_115] : memref<64x64xf32, #tpu.memory_space<vmem>>, vector<8x32xf32>
    tpu.vector_store %arg14[%320, %c0_115], %319 {strides = array<i32>} : memref<64x64xf32, #tpu.memory_space<vmem>>, vector<8x32xf32>,
    %322 = vector.extract_strided_slice %315 {offsets = [0, 32], sizes = [8, 32], strides = [1, 1]} : vector<8x64xf32> to vector<8x32xf32>
    %323 = arith.index_cast %318 : i32 to index
    %c32_116 = arith.constant 32 : index
    %324 = vector.load %arg14[%323, %c32_116] : memref<64x64xf32, #tpu.memory_space<vmem>>, vector<8x32xf32>
    tpu.vector_store %arg14[%323, %c32_116], %322 {strides = array<i32>} : memref<64x64xf32, #tpu.memory_space<vmem>>, vector<8x32xf32>,
    %c6_i32_117 = arith.constant 6 : i32
    %c8_i32_118 = arith.constant 8 : i32
    %325 = arith.muli %c6_i32_117, %c8_i32_118 : i32
    %326 = tpu.assume_multiple %325, 8 : i32
    %cst_119 = arith.constant dense<0.000000e+00> : vector<8x256xf32>
    %327 = tpu.matmul %315, %136, %cst_119 {dimension_numbers = #tpu.dot_dimension_numbers<[1], [0], [0], [1], [0, 0, 1, 1], [], []>} : vector<8x64xf32>, vector<64x256xf32>, vector<8x256xf32> -> vector<8x256xf32>
    %328 = arith.index_cast %326 : i32 to index
    %c0_120 = arith.constant 0 : index
    %329 = vector.load %arg12[%328, %c0_120] : memref<64x256xf32, #tpu.memory_space<vmem>>, vector<8x256xf32>
    %330 = arith.addf %327, %329 : vector<8x256xf32>
    %331 = vector.extract_strided_slice %330 {offsets = [0, 0], sizes = [8, 192], strides = [1, 1]} : vector<8x256xf32> to vector<8x192xf32>
    %332 = arith.negf %331 : vector<8x192xf32>
    %333 = math.exp %332 : vector<8x192xf32>
    %cst_121 = arith.constant 1.000000e+00 : f32
    %334 = vector.broadcast %cst_121 : f32 to vector<8x192xf32>
    %335 = arith.addf %334, %333 : vector<8x192xf32>
    %336 = arith.divf %334, %335 : vector<8x192xf32>
    %337 = vector.extract_strided_slice %330 {offsets = [0, 192], sizes = [8, 64], strides = [1, 1]} : vector<8x256xf32> to vector<8x64xf32>
    %338 = math.tanh %337 : vector<8x64xf32>
    %339 = vector.extract_strided_slice %336 {offsets = [0, 0], sizes = [8, 64], strides = [1, 1]} : vector<8x192xf32> to vector<8x64xf32>
    %340 = vector.extract_strided_slice %336 {offsets = [0, 64], sizes = [8, 64], strides = [1, 1]} : vector<8x192xf32> to vector<8x64xf32>
    %341 = vector.extract_strided_slice %336 {offsets = [0, 128], sizes = [8, 64], strides = [1, 1]} : vector<8x192xf32> to vector<8x64xf32>
    %342 = arith.mulf %340, %313 : vector<8x64xf32>
    %343 = arith.mulf %339, %338 : vector<8x64xf32>
    %344 = arith.addf %342, %343 : vector<8x64xf32>
    %345 = math.tanh %344 : vector<8x64xf32>
    %346 = arith.mulf %341, %345 : vector<8x64xf32>
    %c7_i32_122 = arith.constant 7 : i32
    %347 = arith.subi %c7_i32_122, %c6_i32_117 : i32
    %c8_i32_123 = arith.constant 8 : i32
    %348 = arith.muli %347, %c8_i32_123 : i32
    %349 = tpu.assume_multiple %348, 8 : i32
    %350 = vector.extract_strided_slice %346 {offsets = [0, 0], sizes = [8, 32], strides = [1, 1]} : vector<8x64xf32> to vector<8x32xf32>
    %351 = arith.index_cast %326 : i32 to index
    %c0_124 = arith.constant 0 : index
    %352 = vector.load %arg14[%351, %c0_124] : memref<64x64xf32, #tpu.memory_space<vmem>>, vector<8x32xf32>
    tpu.vector_store %arg14[%351, %c0_124], %350 {strides = array<i32>} : memref<64x64xf32, #tpu.memory_space<vmem>>, vector<8x32xf32>,
    %353 = vector.extract_strided_slice %346 {offsets = [0, 32], sizes = [8, 32], strides = [1, 1]} : vector<8x64xf32> to vector<8x32xf32>
    %354 = arith.index_cast %349 : i32 to index
    %c32_125 = arith.constant 32 : index
    %355 = vector.load %arg14[%354, %c32_125] : memref<64x64xf32, #tpu.memory_space<vmem>>, vector<8x32xf32>
    tpu.vector_store %arg14[%354, %c32_125], %353 {strides = array<i32>} : memref<64x64xf32, #tpu.memory_space<vmem>>, vector<8x32xf32>,
    %c7_i32_126 = arith.constant 7 : i32
    %c8_i32_127 = arith.constant 8 : i32
    %356 = arith.muli %c7_i32_126, %c8_i32_127 : i32
    %357 = tpu.assume_multiple %356, 8 : i32
    %cst_128 = arith.constant dense<0.000000e+00> : vector<8x256xf32>
    %358 = tpu.matmul %346, %136, %cst_128 {dimension_numbers = #tpu.dot_dimension_numbers<[1], [0], [0], [1], [0, 0, 1, 1], [], []>} : vector<8x64xf32>, vector<64x256xf32>, vector<8x256xf32> -> vector<8x256xf32>
    %359 = arith.index_cast %357 : i32 to index
    %c0_129 = arith.constant 0 : index
    %360 = vector.load %arg12[%359, %c0_129] : memref<64x256xf32, #tpu.memory_space<vmem>>, vector<8x256xf32>
    %361 = arith.addf %358, %360 : vector<8x256xf32>
    %362 = vector.extract_strided_slice %361 {offsets = [0, 0], sizes = [8, 192], strides = [1, 1]} : vector<8x256xf32> to vector<8x192xf32>
    %363 = arith.negf %362 : vector<8x192xf32>
    %364 = math.exp %363 : vector<8x192xf32>
    %cst_130 = arith.constant 1.000000e+00 : f32
    %365 = vector.broadcast %cst_130 : f32 to vector<8x192xf32>
    %366 = arith.addf %365, %364 : vector<8x192xf32>
    %367 = arith.divf %365, %366 : vector<8x192xf32>
    %368 = vector.extract_strided_slice %361 {offsets = [0, 192], sizes = [8, 64], strides = [1, 1]} : vector<8x256xf32> to vector<8x64xf32>
    %369 = math.tanh %368 : vector<8x64xf32>
    %370 = vector.extract_strided_slice %367 {offsets = [0, 0], sizes = [8, 64], strides = [1, 1]} : vector<8x192xf32> to vector<8x64xf32>
    %371 = vector.extract_strided_slice %367 {offsets = [0, 64], sizes = [8, 64], strides = [1, 1]} : vector<8x192xf32> to vector<8x64xf32>
    %372 = vector.extract_strided_slice %367 {offsets = [0, 128], sizes = [8, 64], strides = [1, 1]} : vector<8x192xf32> to vector<8x64xf32>
    %373 = arith.mulf %371, %344 : vector<8x64xf32>
    %374 = arith.mulf %370, %369 : vector<8x64xf32>
    %375 = arith.addf %373, %374 : vector<8x64xf32>
    %376 = math.tanh %375 : vector<8x64xf32>
    %377 = arith.mulf %372, %376 : vector<8x64xf32>
    %c7_i32_131 = arith.constant 7 : i32
    %378 = arith.subi %c7_i32_131, %c7_i32_126 : i32
    %c8_i32_132 = arith.constant 8 : i32
    %379 = arith.muli %378, %c8_i32_132 : i32
    %380 = tpu.assume_multiple %379, 8 : i32
    %381 = vector.extract_strided_slice %377 {offsets = [0, 0], sizes = [8, 32], strides = [1, 1]} : vector<8x64xf32> to vector<8x32xf32>
    %382 = arith.index_cast %357 : i32 to index
    %c0_133 = arith.constant 0 : index
    %383 = vector.load %arg14[%382, %c0_133] : memref<64x64xf32, #tpu.memory_space<vmem>>, vector<8x32xf32>
    tpu.vector_store %arg14[%382, %c0_133], %381 {strides = array<i32>} : memref<64x64xf32, #tpu.memory_space<vmem>>, vector<8x32xf32>,
    %384 = vector.extract_strided_slice %377 {offsets = [0, 32], sizes = [8, 32], strides = [1, 1]} : vector<8x64xf32> to vector<8x32xf32>
    %385 = arith.index_cast %380 : i32 to index
    %c32_134 = arith.constant 32 : index
    %386 = vector.load %arg14[%385, %c32_134] : memref<64x64xf32, #tpu.memory_space<vmem>>, vector<8x32xf32>
    tpu.vector_store %arg14[%385, %c32_134], %384 {strides = array<i32>} : memref<64x64xf32, #tpu.memory_space<vmem>>, vector<8x32xf32>,
    %c8_i32_135 = arith.constant 8 : i32
    %c0_136 = arith.constant 0 : index
    %c0_137 = arith.constant 0 : index
    %c0_138 = arith.constant 0 : index
    %387 = vector.load %arg10[%c0_136, %c0_137, %c0_138] : memref<2x8x64xf32, #tpu.memory_space<vmem>>, vector<1x8x64xf32>
    %388 = vector.shape_cast %387 : vector<1x8x64xf32> to vector<8x64xf32>
    %389 = vector.shape_cast %377 : vector<8x64xf32> to vector<1x8x64xf32>
    tpu.vector_store %arg10[%c0_136, %c0_137, %c0_138], %389 {strides = array<i32>} : memref<2x8x64xf32, #tpu.memory_space<vmem>>, vector<1x8x64xf32>,
    %c0_139 = arith.constant 0 : index
    %c0_140 = arith.constant 0 : index
    %c0_141 = arith.constant 0 : index
    %390 = vector.load %arg11[%c0_139, %c0_140, %c0_141] : memref<2x8x64xf32, #tpu.memory_space<vmem>>, vector<1x8x64xf32>
    %391 = vector.shape_cast %390 : vector<1x8x64xf32> to vector<8x64xf32>
    %392 = vector.shape_cast %375 : vector<8x64xf32> to vector<1x8x64xf32>
    tpu.vector_store %arg11[%c0_139, %c0_140, %c0_141], %392 {strides = array<i32>} : memref<2x8x64xf32, #tpu.memory_space<vmem>>, vector<1x8x64xf32>,
    %c0_142 = arith.constant 0 : index
    %c0_143 = arith.constant 0 : index
    %393 = vector.load %arg14[%c0_142, %c0_143] : memref<64x64xf32, #tpu.memory_space<vmem>>, vector<64x64xf32>
    %c0_144 = arith.constant 0 : index
    %c0_145 = arith.constant 0 : index
    %394 = vector.load %arg4[%c0_144, %c0_145] : memref<64x256xf32, #tpu.memory_space<vmem>>, vector<64x256xf32>
    %cst_146 = arith.constant dense<0.000000e+00> : vector<64x256xf32>
    %395 = tpu.matmul %393, %394, %cst_146 {dimension_numbers = #tpu.dot_dimension_numbers<[1], [0], [0], [1], [0, 0, 1, 1], [], []>} : vector<64x64xf32>, vector<64x256xf32>, vector<64x256xf32> -> vector<64x256xf32>
    %c0_147 = arith.constant 0 : index
    %c0_148 = arith.constant 0 : index
    %396 = vector.load %arg13[%c0_147, %c0_148] : memref<64x256xf32, #tpu.memory_space<vmem>>, vector<64x256xf32>
    tpu.vector_store %arg13[%c0_147, %c0_148], %395 {strides = array<i32>} : memref<64x256xf32, #tpu.memory_space<vmem>>, vector<64x256xf32>,
    %c0_149 = arith.constant 0 : index
    %c0_150 = arith.constant 0 : index
    %397 = vector.load %arg6[%c0_149, %c0_150] : memref<1x256xf32, #tpu.memory_space<vmem>>, vector<1x256xf32>
    %c0_i32_151 = arith.constant 0 : i32
    %c8_i32_152 = arith.constant 8 : i32
    %398 = arith.muli %c0_i32_151, %c8_i32_152 : i32
    %399 = tpu.assume_multiple %398, 8 : i32
    %c7_i32_153 = arith.constant 7 : i32
    %400 = arith.subi %c7_i32_153, %c0_i32_151 : i32
    %c8_i32_154 = arith.constant 8 : i32
    %401 = arith.muli %400, %c8_i32_154 : i32
    %402 = tpu.assume_multiple %401, 8 : i32
    %403 = arith.index_cast %399 : i32 to index
    %c0_155 = arith.constant 0 : index
    %404 = vector.load %arg13[%403, %c0_155] : memref<64x256xf32, #tpu.memory_space<vmem>>, vector<8x256xf32>
    %405 = arith.index_cast %402 : i32 to index
    %c0_156 = arith.constant 0 : index
    %406 = vector.load %arg13[%405, %c0_156] : memref<64x256xf32, #tpu.memory_space<vmem>>, vector<8x256xf32>
    %407 = arith.select %18, %404, %406 : vector<8x256xi1>, vector<8x256xf32>
    %408 = vector.broadcast %397 : vector<1x256xf32> to vector<8x256xf32>
    %409 = arith.addf %407, %408 : vector<8x256xf32>
    %410 = arith.index_cast %399 : i32 to index
    %c0_157 = arith.constant 0 : index
    %411 = vector.load %arg12[%410, %c0_157] : memref<64x256xf32, #tpu.memory_space<vmem>>, vector<8x256xf32>
    tpu.vector_store %arg12[%410, %c0_157], %409 {strides = array<i32>} : memref<64x256xf32, #tpu.memory_space<vmem>>, vector<8x256xf32>,
    %c1_i32_158 = arith.constant 1 : i32
    %c8_i32_159 = arith.constant 8 : i32
    %412 = arith.muli %c1_i32_158, %c8_i32_159 : i32
    %413 = tpu.assume_multiple %412, 8 : i32
    %c7_i32_160 = arith.constant 7 : i32
    %414 = arith.subi %c7_i32_160, %c1_i32_158 : i32
    %c8_i32_161 = arith.constant 8 : i32
    %415 = arith.muli %414, %c8_i32_161 : i32
    %416 = tpu.assume_multiple %415, 8 : i32
    %417 = arith.index_cast %413 : i32 to index
    %c0_162 = arith.constant 0 : index
    %418 = vector.load %arg13[%417, %c0_162] : memref<64x256xf32, #tpu.memory_space<vmem>>, vector<8x256xf32>
    %419 = arith.index_cast %416 : i32 to index
    %c0_163 = arith.constant 0 : index
    %420 = vector.load %arg13[%419, %c0_163] : memref<64x256xf32, #tpu.memory_space<vmem>>, vector<8x256xf32>
    %421 = arith.select %18, %418, %420 : vector<8x256xi1>, vector<8x256xf32>
    %422 = vector.broadcast %397 : vector<1x256xf32> to vector<8x256xf32>
    %423 = arith.addf %421, %422 : vector<8x256xf32>
    %424 = arith.index_cast %413 : i32 to index
    %c0_164 = arith.constant 0 : index
    %425 = vector.load %arg12[%424, %c0_164] : memref<64x256xf32, #tpu.memory_space<vmem>>, vector<8x256xf32>
    tpu.vector_store %arg12[%424, %c0_164], %423 {strides = array<i32>} : memref<64x256xf32, #tpu.memory_space<vmem>>, vector<8x256xf32>,
    %c2_i32_165 = arith.constant 2 : i32
    %c8_i32_166 = arith.constant 8 : i32
    %426 = arith.muli %c2_i32_165, %c8_i32_166 : i32
    %427 = tpu.assume_multiple %426, 8 : i32
    %c7_i32_167 = arith.constant 7 : i32
    %428 = arith.subi %c7_i32_167, %c2_i32_165 : i32
    %c8_i32_168 = arith.constant 8 : i32
    %429 = arith.muli %428, %c8_i32_168 : i32
    %430 = tpu.assume_multiple %429, 8 : i32
    %431 = arith.index_cast %427 : i32 to index
    %c0_169 = arith.constant 0 : index
    %432 = vector.load %arg13[%431, %c0_169] : memref<64x256xf32, #tpu.memory_space<vmem>>, vector<8x256xf32>
    %433 = arith.index_cast %430 : i32 to index
    %c0_170 = arith.constant 0 : index
    %434 = vector.load %arg13[%433, %c0_170] : memref<64x256xf32, #tpu.memory_space<vmem>>, vector<8x256xf32>
    %435 = arith.select %18, %432, %434 : vector<8x256xi1>, vector<8x256xf32>
    %436 = vector.broadcast %397 : vector<1x256xf32> to vector<8x256xf32>
    %437 = arith.addf %435, %436 : vector<8x256xf32>
    %438 = arith.index_cast %427 : i32 to index
    %c0_171 = arith.constant 0 : index
    %439 = vector.load %arg12[%438, %c0_171] : memref<64x256xf32, #tpu.memory_space<vmem>>, vector<8x256xf32>
    tpu.vector_store %arg12[%438, %c0_171], %437 {strides = array<i32>} : memref<64x256xf32, #tpu.memory_space<vmem>>, vector<8x256xf32>,
    %c3_i32_172 = arith.constant 3 : i32
    %c8_i32_173 = arith.constant 8 : i32
    %440 = arith.muli %c3_i32_172, %c8_i32_173 : i32
    %441 = tpu.assume_multiple %440, 8 : i32
    %c7_i32_174 = arith.constant 7 : i32
    %442 = arith.subi %c7_i32_174, %c3_i32_172 : i32
    %c8_i32_175 = arith.constant 8 : i32
    %443 = arith.muli %442, %c8_i32_175 : i32
    %444 = tpu.assume_multiple %443, 8 : i32
    %445 = arith.index_cast %441 : i32 to index
    %c0_176 = arith.constant 0 : index
    %446 = vector.load %arg13[%445, %c0_176] : memref<64x256xf32, #tpu.memory_space<vmem>>, vector<8x256xf32>
    %447 = arith.index_cast %444 : i32 to index
    %c0_177 = arith.constant 0 : index
    %448 = vector.load %arg13[%447, %c0_177] : memref<64x256xf32, #tpu.memory_space<vmem>>, vector<8x256xf32>
    %449 = arith.select %18, %446, %448 : vector<8x256xi1>, vector<8x256xf32>
    %450 = vector.broadcast %397 : vector<1x256xf32> to vector<8x256xf32>
    %451 = arith.addf %449, %450 : vector<8x256xf32>
    %452 = arith.index_cast %441 : i32 to index
    %c0_178 = arith.constant 0 : index
    %453 = vector.load %arg12[%452, %c0_178] : memref<64x256xf32, #tpu.memory_space<vmem>>, vector<8x256xf32>
    tpu.vector_store %arg12[%452, %c0_178], %451 {strides = array<i32>} : memref<64x256xf32, #tpu.memory_space<vmem>>, vector<8x256xf32>,
    %c4_i32_179 = arith.constant 4 : i32
    %c8_i32_180 = arith.constant 8 : i32
    %454 = arith.muli %c4_i32_179, %c8_i32_180 : i32
    %455 = tpu.assume_multiple %454, 8 : i32
    %c7_i32_181 = arith.constant 7 : i32
    %456 = arith.subi %c7_i32_181, %c4_i32_179 : i32
    %c8_i32_182 = arith.constant 8 : i32
    %457 = arith.muli %456, %c8_i32_182 : i32
    %458 = tpu.assume_multiple %457, 8 : i32
    %459 = arith.index_cast %455 : i32 to index
    %c0_183 = arith.constant 0 : index
    %460 = vector.load %arg13[%459, %c0_183] : memref<64x256xf32, #tpu.memory_space<vmem>>, vector<8x256xf32>
    %461 = arith.index_cast %458 : i32 to index
    %c0_184 = arith.constant 0 : index
    %462 = vector.load %arg13[%461, %c0_184] : memref<64x256xf32, #tpu.memory_space<vmem>>, vector<8x256xf32>
    %463 = arith.select %18, %460, %462 : vector<8x256xi1>, vector<8x256xf32>
    %464 = vector.broadcast %397 : vector<1x256xf32> to vector<8x256xf32>
    %465 = arith.addf %463, %464 : vector<8x256xf32>
    %466 = arith.index_cast %455 : i32 to index
    %c0_185 = arith.constant 0 : index
    %467 = vector.load %arg12[%466, %c0_185] : memref<64x256xf32, #tpu.memory_space<vmem>>, vector<8x256xf32>
    tpu.vector_store %arg12[%466, %c0_185], %465 {strides = array<i32>} : memref<64x256xf32, #tpu.memory_space<vmem>>, vector<8x256xf32>,
    %c5_i32_186 = arith.constant 5 : i32
    %c8_i32_187 = arith.constant 8 : i32
    %468 = arith.muli %c5_i32_186, %c8_i32_187 : i32
    %469 = tpu.assume_multiple %468, 8 : i32
    %c7_i32_188 = arith.constant 7 : i32
    %470 = arith.subi %c7_i32_188, %c5_i32_186 : i32
    %c8_i32_189 = arith.constant 8 : i32
    %471 = arith.muli %470, %c8_i32_189 : i32
    %472 = tpu.assume_multiple %471, 8 : i32
    %473 = arith.index_cast %469 : i32 to index
    %c0_190 = arith.constant 0 : index
    %474 = vector.load %arg13[%473, %c0_190] : memref<64x256xf32, #tpu.memory_space<vmem>>, vector<8x256xf32>
    %475 = arith.index_cast %472 : i32 to index
    %c0_191 = arith.constant 0 : index
    %476 = vector.load %arg13[%475, %c0_191] : memref<64x256xf32, #tpu.memory_space<vmem>>, vector<8x256xf32>
    %477 = arith.select %18, %474, %476 : vector<8x256xi1>, vector<8x256xf32>
    %478 = vector.broadcast %397 : vector<1x256xf32> to vector<8x256xf32>
    %479 = arith.addf %477, %478 : vector<8x256xf32>
    %480 = arith.index_cast %469 : i32 to index
    %c0_192 = arith.constant 0 : index
    %481 = vector.load %arg12[%480, %c0_192] : memref<64x256xf32, #tpu.memory_space<vmem>>, vector<8x256xf32>
    tpu.vector_store %arg12[%480, %c0_192], %479 {strides = array<i32>} : memref<64x256xf32, #tpu.memory_space<vmem>>, vector<8x256xf32>,
    %c6_i32_193 = arith.constant 6 : i32
    %c8_i32_194 = arith.constant 8 : i32
    %482 = arith.muli %c6_i32_193, %c8_i32_194 : i32
    %483 = tpu.assume_multiple %482, 8 : i32
    %c7_i32_195 = arith.constant 7 : i32
    %484 = arith.subi %c7_i32_195, %c6_i32_193 : i32
    %c8_i32_196 = arith.constant 8 : i32
    %485 = arith.muli %484, %c8_i32_196 : i32
    %486 = tpu.assume_multiple %485, 8 : i32
    %487 = arith.index_cast %483 : i32 to index
    %c0_197 = arith.constant 0 : index
    %488 = vector.load %arg13[%487, %c0_197] : memref<64x256xf32, #tpu.memory_space<vmem>>, vector<8x256xf32>
    %489 = arith.index_cast %486 : i32 to index
    %c0_198 = arith.constant 0 : index
    %490 = vector.load %arg13[%489, %c0_198] : memref<64x256xf32, #tpu.memory_space<vmem>>, vector<8x256xf32>
    %491 = arith.select %18, %488, %490 : vector<8x256xi1>, vector<8x256xf32>
    %492 = vector.broadcast %397 : vector<1x256xf32> to vector<8x256xf32>
    %493 = arith.addf %491, %492 : vector<8x256xf32>
    %494 = arith.index_cast %483 : i32 to index
    %c0_199 = arith.constant 0 : index
    %495 = vector.load %arg12[%494, %c0_199] : memref<64x256xf32, #tpu.memory_space<vmem>>, vector<8x256xf32>
    tpu.vector_store %arg12[%494, %c0_199], %493 {strides = array<i32>} : memref<64x256xf32, #tpu.memory_space<vmem>>, vector<8x256xf32>,
    %c7_i32_200 = arith.constant 7 : i32
    %c8_i32_201 = arith.constant 8 : i32
    %496 = arith.muli %c7_i32_200, %c8_i32_201 : i32
    %497 = tpu.assume_multiple %496, 8 : i32
    %c7_i32_202 = arith.constant 7 : i32
    %498 = arith.subi %c7_i32_202, %c7_i32_200 : i32
    %c8_i32_203 = arith.constant 8 : i32
    %499 = arith.muli %498, %c8_i32_203 : i32
    %500 = tpu.assume_multiple %499, 8 : i32
    %501 = arith.index_cast %497 : i32 to index
    %c0_204 = arith.constant 0 : index
    %502 = vector.load %arg13[%501, %c0_204] : memref<64x256xf32, #tpu.memory_space<vmem>>, vector<8x256xf32>
    %503 = arith.index_cast %500 : i32 to index
    %c0_205 = arith.constant 0 : index
    %504 = vector.load %arg13[%503, %c0_205] : memref<64x256xf32, #tpu.memory_space<vmem>>, vector<8x256xf32>
    %505 = arith.select %18, %502, %504 : vector<8x256xi1>, vector<8x256xf32>
    %506 = vector.broadcast %397 : vector<1x256xf32> to vector<8x256xf32>
    %507 = arith.addf %505, %506 : vector<8x256xf32>
    %508 = arith.index_cast %497 : i32 to index
    %c0_206 = arith.constant 0 : index
    %509 = vector.load %arg12[%508, %c0_206] : memref<64x256xf32, #tpu.memory_space<vmem>>, vector<8x256xf32>
    tpu.vector_store %arg12[%508, %c0_206], %507 {strides = array<i32>} : memref<64x256xf32, #tpu.memory_space<vmem>>, vector<8x256xf32>,
    %c8_i32_207 = arith.constant 8 : i32
    %c0_208 = arith.constant 0 : index
    %c0_209 = arith.constant 0 : index
    %510 = vector.load %arg5[%c0_208, %c0_209] : memref<64x256xf32, #tpu.memory_space<vmem>>, vector<64x256xf32>
    %cst_210 = arith.constant 0.000000e+00 : f32
    %511 = vector.broadcast %cst_210 : f32 to vector<8x64xf32>
    %cst_211 = arith.constant 0.000000e+00 : f32
    %512 = vector.broadcast %cst_211 : f32 to vector<8x64xf32>
    %c0_i32_212 = arith.constant 0 : i32
    %c8_i32_213 = arith.constant 8 : i32
    %513 = arith.muli %c0_i32_212, %c8_i32_213 : i32
    %514 = tpu.assume_multiple %513, 8 : i32
    %cst_214 = arith.constant dense<0.000000e+00> : vector<8x256xf32>
    %515 = tpu.matmul %511, %510, %cst_214 {dimension_numbers = #tpu.dot_dimension_numbers<[1], [0], [0], [1], [0, 0, 1, 1], [], []>} : vector<8x64xf32>, vector<64x256xf32>, vector<8x256xf32> -> vector<8x256xf32>
    %516 = arith.index_cast %514 : i32 to index
    %c0_215 = arith.constant 0 : index
    %517 = vector.load %arg12[%516, %c0_215] : memref<64x256xf32, #tpu.memory_space<vmem>>, vector<8x256xf32>
    %518 = arith.addf %515, %517 : vector<8x256xf32>
    %519 = vector.extract_strided_slice %518 {offsets = [0, 0], sizes = [8, 192], strides = [1, 1]} : vector<8x256xf32> to vector<8x192xf32>
    %520 = arith.negf %519 : vector<8x192xf32>
    %521 = math.exp %520 : vector<8x192xf32>
    %cst_216 = arith.constant 1.000000e+00 : f32
    %522 = vector.broadcast %cst_216 : f32 to vector<8x192xf32>
    %523 = arith.addf %522, %521 : vector<8x192xf32>
    %524 = arith.divf %522, %523 : vector<8x192xf32>
    %525 = vector.extract_strided_slice %518 {offsets = [0, 192], sizes = [8, 64], strides = [1, 1]} : vector<8x256xf32> to vector<8x64xf32>
    %526 = math.tanh %525 : vector<8x64xf32>
    %527 = vector.extract_strided_slice %524 {offsets = [0, 0], sizes = [8, 64], strides = [1, 1]} : vector<8x192xf32> to vector<8x64xf32>
    %528 = vector.extract_strided_slice %524 {offsets = [0, 64], sizes = [8, 64], strides = [1, 1]} : vector<8x192xf32> to vector<8x64xf32>
    %529 = vector.extract_strided_slice %524 {offsets = [0, 128], sizes = [8, 64], strides = [1, 1]} : vector<8x192xf32> to vector<8x64xf32>
    %530 = arith.mulf %528, %512 : vector<8x64xf32>
    %531 = arith.mulf %527, %526 : vector<8x64xf32>
    %532 = arith.addf %530, %531 : vector<8x64xf32>
    %533 = math.tanh %532 : vector<8x64xf32>
    %534 = arith.mulf %529, %533 : vector<8x64xf32>
    %c1_i32_217 = arith.constant 1 : i32
    %c8_i32_218 = arith.constant 8 : i32
    %535 = arith.muli %c1_i32_217, %c8_i32_218 : i32
    %536 = tpu.assume_multiple %535, 8 : i32
    %cst_219 = arith.constant dense<0.000000e+00> : vector<8x256xf32>
    %537 = tpu.matmul %534, %510, %cst_219 {dimension_numbers = #tpu.dot_dimension_numbers<[1], [0], [0], [1], [0, 0, 1, 1], [], []>} : vector<8x64xf32>, vector<64x256xf32>, vector<8x256xf32> -> vector<8x256xf32>
    %538 = arith.index_cast %536 : i32 to index
    %c0_220 = arith.constant 0 : index
    %539 = vector.load %arg12[%538, %c0_220] : memref<64x256xf32, #tpu.memory_space<vmem>>, vector<8x256xf32>
    %540 = arith.addf %537, %539 : vector<8x256xf32>
    %541 = vector.extract_strided_slice %540 {offsets = [0, 0], sizes = [8, 192], strides = [1, 1]} : vector<8x256xf32> to vector<8x192xf32>
    %542 = arith.negf %541 : vector<8x192xf32>
    %543 = math.exp %542 : vector<8x192xf32>
    %cst_221 = arith.constant 1.000000e+00 : f32
    %544 = vector.broadcast %cst_221 : f32 to vector<8x192xf32>
    %545 = arith.addf %544, %543 : vector<8x192xf32>
    %546 = arith.divf %544, %545 : vector<8x192xf32>
    %547 = vector.extract_strided_slice %540 {offsets = [0, 192], sizes = [8, 64], strides = [1, 1]} : vector<8x256xf32> to vector<8x64xf32>
    %548 = math.tanh %547 : vector<8x64xf32>
    %549 = vector.extract_strided_slice %546 {offsets = [0, 0], sizes = [8, 64], strides = [1, 1]} : vector<8x192xf32> to vector<8x64xf32>
    %550 = vector.extract_strided_slice %546 {offsets = [0, 64], sizes = [8, 64], strides = [1, 1]} : vector<8x192xf32> to vector<8x64xf32>
    %551 = vector.extract_strided_slice %546 {offsets = [0, 128], sizes = [8, 64], strides = [1, 1]} : vector<8x192xf32> to vector<8x64xf32>
    %552 = arith.mulf %550, %532 : vector<8x64xf32>
    %553 = arith.mulf %549, %548 : vector<8x64xf32>
    %554 = arith.addf %552, %553 : vector<8x64xf32>
    %555 = math.tanh %554 : vector<8x64xf32>
    %556 = arith.mulf %551, %555 : vector<8x64xf32>
    %c2_i32_222 = arith.constant 2 : i32
    %c8_i32_223 = arith.constant 8 : i32
    %557 = arith.muli %c2_i32_222, %c8_i32_223 : i32
    %558 = tpu.assume_multiple %557, 8 : i32
    %cst_224 = arith.constant dense<0.000000e+00> : vector<8x256xf32>
    %559 = tpu.matmul %556, %510, %cst_224 {dimension_numbers = #tpu.dot_dimension_numbers<[1], [0], [0], [1], [0, 0, 1, 1], [], []>} : vector<8x64xf32>, vector<64x256xf32>, vector<8x256xf32> -> vector<8x256xf32>
    %560 = arith.index_cast %558 : i32 to index
    %c0_225 = arith.constant 0 : index
    %561 = vector.load %arg12[%560, %c0_225] : memref<64x256xf32, #tpu.memory_space<vmem>>, vector<8x256xf32>
    %562 = arith.addf %559, %561 : vector<8x256xf32>
    %563 = vector.extract_strided_slice %562 {offsets = [0, 0], sizes = [8, 192], strides = [1, 1]} : vector<8x256xf32> to vector<8x192xf32>
    %564 = arith.negf %563 : vector<8x192xf32>
    %565 = math.exp %564 : vector<8x192xf32>
    %cst_226 = arith.constant 1.000000e+00 : f32
    %566 = vector.broadcast %cst_226 : f32 to vector<8x192xf32>
    %567 = arith.addf %566, %565 : vector<8x192xf32>
    %568 = arith.divf %566, %567 : vector<8x192xf32>
    %569 = vector.extract_strided_slice %562 {offsets = [0, 192], sizes = [8, 64], strides = [1, 1]} : vector<8x256xf32> to vector<8x64xf32>
    %570 = math.tanh %569 : vector<8x64xf32>
    %571 = vector.extract_strided_slice %568 {offsets = [0, 0], sizes = [8, 64], strides = [1, 1]} : vector<8x192xf32> to vector<8x64xf32>
    %572 = vector.extract_strided_slice %568 {offsets = [0, 64], sizes = [8, 64], strides = [1, 1]} : vector<8x192xf32> to vector<8x64xf32>
    %573 = vector.extract_strided_slice %568 {offsets = [0, 128], sizes = [8, 64], strides = [1, 1]} : vector<8x192xf32> to vector<8x64xf32>
    %574 = arith.mulf %572, %554 : vector<8x64xf32>
    %575 = arith.mulf %571, %570 : vector<8x64xf32>
    %576 = arith.addf %574, %575 : vector<8x64xf32>
    %577 = math.tanh %576 : vector<8x64xf32>
    %578 = arith.mulf %573, %577 : vector<8x64xf32>
    %c3_i32_227 = arith.constant 3 : i32
    %c8_i32_228 = arith.constant 8 : i32
    %579 = arith.muli %c3_i32_227, %c8_i32_228 : i32
    %580 = tpu.assume_multiple %579, 8 : i32
    %cst_229 = arith.constant dense<0.000000e+00> : vector<8x256xf32>
    %581 = tpu.matmul %578, %510, %cst_229 {dimension_numbers = #tpu.dot_dimension_numbers<[1], [0], [0], [1], [0, 0, 1, 1], [], []>} : vector<8x64xf32>, vector<64x256xf32>, vector<8x256xf32> -> vector<8x256xf32>
    %582 = arith.index_cast %580 : i32 to index
    %c0_230 = arith.constant 0 : index
    %583 = vector.load %arg12[%582, %c0_230] : memref<64x256xf32, #tpu.memory_space<vmem>>, vector<8x256xf32>
    %584 = arith.addf %581, %583 : vector<8x256xf32>
    %585 = vector.extract_strided_slice %584 {offsets = [0, 0], sizes = [8, 192], strides = [1, 1]} : vector<8x256xf32> to vector<8x192xf32>
    %586 = arith.negf %585 : vector<8x192xf32>
    %587 = math.exp %586 : vector<8x192xf32>
    %cst_231 = arith.constant 1.000000e+00 : f32
    %588 = vector.broadcast %cst_231 : f32 to vector<8x192xf32>
    %589 = arith.addf %588, %587 : vector<8x192xf32>
    %590 = arith.divf %588, %589 : vector<8x192xf32>
    %591 = vector.extract_strided_slice %584 {offsets = [0, 192], sizes = [8, 64], strides = [1, 1]} : vector<8x256xf32> to vector<8x64xf32>
    %592 = math.tanh %591 : vector<8x64xf32>
    %593 = vector.extract_strided_slice %590 {offsets = [0, 0], sizes = [8, 64], strides = [1, 1]} : vector<8x192xf32> to vector<8x64xf32>
    %594 = vector.extract_strided_slice %590 {offsets = [0, 64], sizes = [8, 64], strides = [1, 1]} : vector<8x192xf32> to vector<8x64xf32>
    %595 = vector.extract_strided_slice %590 {offsets = [0, 128], sizes = [8, 64], strides = [1, 1]} : vector<8x192xf32> to vector<8x64xf32>
    %596 = arith.mulf %594, %576 : vector<8x64xf32>
    %597 = arith.mulf %593, %592 : vector<8x64xf32>
    %598 = arith.addf %596, %597 : vector<8x64xf32>
    %599 = math.tanh %598 : vector<8x64xf32>
    %600 = arith.mulf %595, %599 : vector<8x64xf32>
    %c4_i32_232 = arith.constant 4 : i32
    %c8_i32_233 = arith.constant 8 : i32
    %601 = arith.muli %c4_i32_232, %c8_i32_233 : i32
    %602 = tpu.assume_multiple %601, 8 : i32
    %cst_234 = arith.constant dense<0.000000e+00> : vector<8x256xf32>
    %603 = tpu.matmul %600, %510, %cst_234 {dimension_numbers = #tpu.dot_dimension_numbers<[1], [0], [0], [1], [0, 0, 1, 1], [], []>} : vector<8x64xf32>, vector<64x256xf32>, vector<8x256xf32> -> vector<8x256xf32>
    %604 = arith.index_cast %602 : i32 to index
    %c0_235 = arith.constant 0 : index
    %605 = vector.load %arg12[%604, %c0_235] : memref<64x256xf32, #tpu.memory_space<vmem>>, vector<8x256xf32>
    %606 = arith.addf %603, %605 : vector<8x256xf32>
    %607 = vector.extract_strided_slice %606 {offsets = [0, 0], sizes = [8, 192], strides = [1, 1]} : vector<8x256xf32> to vector<8x192xf32>
    %608 = arith.negf %607 : vector<8x192xf32>
    %609 = math.exp %608 : vector<8x192xf32>
    %cst_236 = arith.constant 1.000000e+00 : f32
    %610 = vector.broadcast %cst_236 : f32 to vector<8x192xf32>
    %611 = arith.addf %610, %609 : vector<8x192xf32>
    %612 = arith.divf %610, %611 : vector<8x192xf32>
    %613 = vector.extract_strided_slice %606 {offsets = [0, 192], sizes = [8, 64], strides = [1, 1]} : vector<8x256xf32> to vector<8x64xf32>
    %614 = math.tanh %613 : vector<8x64xf32>
    %615 = vector.extract_strided_slice %612 {offsets = [0, 0], sizes = [8, 64], strides = [1, 1]} : vector<8x192xf32> to vector<8x64xf32>
    %616 = vector.extract_strided_slice %612 {offsets = [0, 64], sizes = [8, 64], strides = [1, 1]} : vector<8x192xf32> to vector<8x64xf32>
    %617 = vector.extract_strided_slice %612 {offsets = [0, 128], sizes = [8, 64], strides = [1, 1]} : vector<8x192xf32> to vector<8x64xf32>
    %618 = arith.mulf %616, %598 : vector<8x64xf32>
    %619 = arith.mulf %615, %614 : vector<8x64xf32>
    %620 = arith.addf %618, %619 : vector<8x64xf32>
    %621 = math.tanh %620 : vector<8x64xf32>
    %622 = arith.mulf %617, %621 : vector<8x64xf32>
    %c5_i32_237 = arith.constant 5 : i32
    %c8_i32_238 = arith.constant 8 : i32
    %623 = arith.muli %c5_i32_237, %c8_i32_238 : i32
    %624 = tpu.assume_multiple %623, 8 : i32
    %cst_239 = arith.constant dense<0.000000e+00> : vector<8x256xf32>
    %625 = tpu.matmul %622, %510, %cst_239 {dimension_numbers = #tpu.dot_dimension_numbers<[1], [0], [0], [1], [0, 0, 1, 1], [], []>} : vector<8x64xf32>, vector<64x256xf32>, vector<8x256xf32> -> vector<8x256xf32>
    %626 = arith.index_cast %624 : i32 to index
    %c0_240 = arith.constant 0 : index
    %627 = vector.load %arg12[%626, %c0_240] : memref<64x256xf32, #tpu.memory_space<vmem>>, vector<8x256xf32>
    %628 = arith.addf %625, %627 : vector<8x256xf32>
    %629 = vector.extract_strided_slice %628 {offsets = [0, 0], sizes = [8, 192], strides = [1, 1]} : vector<8x256xf32> to vector<8x192xf32>
    %630 = arith.negf %629 : vector<8x192xf32>
    %631 = math.exp %630 : vector<8x192xf32>
    %cst_241 = arith.constant 1.000000e+00 : f32
    %632 = vector.broadcast %cst_241 : f32 to vector<8x192xf32>
    %633 = arith.addf %632, %631 : vector<8x192xf32>
    %634 = arith.divf %632, %633 : vector<8x192xf32>
    %635 = vector.extract_strided_slice %628 {offsets = [0, 192], sizes = [8, 64], strides = [1, 1]} : vector<8x256xf32> to vector<8x64xf32>
    %636 = math.tanh %635 : vector<8x64xf32>
    %637 = vector.extract_strided_slice %634 {offsets = [0, 0], sizes = [8, 64], strides = [1, 1]} : vector<8x192xf32> to vector<8x64xf32>
    %638 = vector.extract_strided_slice %634 {offsets = [0, 64], sizes = [8, 64], strides = [1, 1]} : vector<8x192xf32> to vector<8x64xf32>
    %639 = vector.extract_strided_slice %634 {offsets = [0, 128], sizes = [8, 64], strides = [1, 1]} : vector<8x192xf32> to vector<8x64xf32>
    %640 = arith.mulf %638, %620 : vector<8x64xf32>
    %641 = arith.mulf %637, %636 : vector<8x64xf32>
    %642 = arith.addf %640, %641 : vector<8x64xf32>
    %643 = math.tanh %642 : vector<8x64xf32>
    %644 = arith.mulf %639, %643 : vector<8x64xf32>
    %c6_i32_242 = arith.constant 6 : i32
    %c8_i32_243 = arith.constant 8 : i32
    %645 = arith.muli %c6_i32_242, %c8_i32_243 : i32
    %646 = tpu.assume_multiple %645, 8 : i32
    %cst_244 = arith.constant dense<0.000000e+00> : vector<8x256xf32>
    %647 = tpu.matmul %644, %510, %cst_244 {dimension_numbers = #tpu.dot_dimension_numbers<[1], [0], [0], [1], [0, 0, 1, 1], [], []>} : vector<8x64xf32>, vector<64x256xf32>, vector<8x256xf32> -> vector<8x256xf32>
    %648 = arith.index_cast %646 : i32 to index
    %c0_245 = arith.constant 0 : index
    %649 = vector.load %arg12[%648, %c0_245] : memref<64x256xf32, #tpu.memory_space<vmem>>, vector<8x256xf32>
    %650 = arith.addf %647, %649 : vector<8x256xf32>
    %651 = vector.extract_strided_slice %650 {offsets = [0, 0], sizes = [8, 192], strides = [1, 1]} : vector<8x256xf32> to vector<8x192xf32>
    %652 = arith.negf %651 : vector<8x192xf32>
    %653 = math.exp %652 : vector<8x192xf32>
    %cst_246 = arith.constant 1.000000e+00 : f32
    %654 = vector.broadcast %cst_246 : f32 to vector<8x192xf32>
    %655 = arith.addf %654, %653 : vector<8x192xf32>
    %656 = arith.divf %654, %655 : vector<8x192xf32>
    %657 = vector.extract_strided_slice %650 {offsets = [0, 192], sizes = [8, 64], strides = [1, 1]} : vector<8x256xf32> to vector<8x64xf32>
    %658 = math.tanh %657 : vector<8x64xf32>
    %659 = vector.extract_strided_slice %656 {offsets = [0, 0], sizes = [8, 64], strides = [1, 1]} : vector<8x192xf32> to vector<8x64xf32>
    %660 = vector.extract_strided_slice %656 {offsets = [0, 64], sizes = [8, 64], strides = [1, 1]} : vector<8x192xf32> to vector<8x64xf32>
    %661 = vector.extract_strided_slice %656 {offsets = [0, 128], sizes = [8, 64], strides = [1, 1]} : vector<8x192xf32> to vector<8x64xf32>
    %662 = arith.mulf %660, %642 : vector<8x64xf32>
    %663 = arith.mulf %659, %658 : vector<8x64xf32>
    %664 = arith.addf %662, %663 : vector<8x64xf32>
    %665 = math.tanh %664 : vector<8x64xf32>
    %666 = arith.mulf %661, %665 : vector<8x64xf32>
    %c7_i32_247 = arith.constant 7 : i32
    %c8_i32_248 = arith.constant 8 : i32
    %667 = arith.muli %c7_i32_247, %c8_i32_248 : i32
    %668 = tpu.assume_multiple %667, 8 : i32
    %cst_249 = arith.constant dense<0.000000e+00> : vector<8x256xf32>
    %669 = tpu.matmul %666, %510, %cst_249 {dimension_numbers = #tpu.dot_dimension_numbers<[1], [0], [0], [1], [0, 0, 1, 1], [], []>} : vector<8x64xf32>, vector<64x256xf32>, vector<8x256xf32> -> vector<8x256xf32>
    %670 = arith.index_cast %668 : i32 to index
    %c0_250 = arith.constant 0 : index
    %671 = vector.load %arg12[%670, %c0_250] : memref<64x256xf32, #tpu.memory_space<vmem>>, vector<8x256xf32>
    %672 = arith.addf %669, %671 : vector<8x256xf32>
    %673 = vector.extract_strided_slice %672 {offsets = [0, 0], sizes = [8, 192], strides = [1, 1]} : vector<8x256xf32> to vector<8x192xf32>
    %674 = arith.negf %673 : vector<8x192xf32>
    %675 = math.exp %674 : vector<8x192xf32>
    %cst_251 = arith.constant 1.000000e+00 : f32
    %676 = vector.broadcast %cst_251 : f32 to vector<8x192xf32>
    %677 = arith.addf %676, %675 : vector<8x192xf32>
    %678 = arith.divf %676, %677 : vector<8x192xf32>
    %679 = vector.extract_strided_slice %672 {offsets = [0, 192], sizes = [8, 64], strides = [1, 1]} : vector<8x256xf32> to vector<8x64xf32>
    %680 = math.tanh %679 : vector<8x64xf32>
    %681 = vector.extract_strided_slice %678 {offsets = [0, 0], sizes = [8, 64], strides = [1, 1]} : vector<8x192xf32> to vector<8x64xf32>
    %682 = vector.extract_strided_slice %678 {offsets = [0, 64], sizes = [8, 64], strides = [1, 1]} : vector<8x192xf32> to vector<8x64xf32>
    %683 = vector.extract_strided_slice %678 {offsets = [0, 128], sizes = [8, 64], strides = [1, 1]} : vector<8x192xf32> to vector<8x64xf32>
    %684 = arith.mulf %682, %664 : vector<8x64xf32>
    %685 = arith.mulf %681, %680 : vector<8x64xf32>
    %686 = arith.addf %684, %685 : vector<8x64xf32>
    %687 = math.tanh %686 : vector<8x64xf32>
    %688 = arith.mulf %683, %687 : vector<8x64xf32>
    %c8_i32_252 = arith.constant 8 : i32
    %c1 = arith.constant 1 : index
    %c0_253 = arith.constant 0 : index
    %c0_254 = arith.constant 0 : index
    %689 = vector.load %arg10[%c1, %c0_253, %c0_254] : memref<2x8x64xf32, #tpu.memory_space<vmem>>, vector<1x8x64xf32>
    %690 = vector.shape_cast %689 : vector<1x8x64xf32> to vector<8x64xf32>
    %691 = vector.shape_cast %688 : vector<8x64xf32> to vector<1x8x64xf32>
    tpu.vector_store %arg10[%c1, %c0_253, %c0_254], %691 {strides = array<i32>} : memref<2x8x64xf32, #tpu.memory_space<vmem>>, vector<1x8x64xf32>,
    %c1_255 = arith.constant 1 : index
    %c0_256 = arith.constant 0 : index
    %c0_257 = arith.constant 0 : index
    %692 = vector.load %arg11[%c1_255, %c0_256, %c0_257] : memref<2x8x64xf32, #tpu.memory_space<vmem>>, vector<1x8x64xf32>
    %693 = vector.shape_cast %692 : vector<1x8x64xf32> to vector<8x64xf32>
    %694 = vector.shape_cast %686 : vector<8x64xf32> to vector<1x8x64xf32>
    tpu.vector_store %arg11[%c1_255, %c0_256, %c0_257], %694 {strides = array<i32>} : memref<2x8x64xf32, #tpu.memory_space<vmem>>, vector<1x8x64xf32>,
    %c0_258 = arith.constant 0 : index
    %c0_259 = arith.constant 0 : index
    %695 = vector.load %arg7[%c0_258, %c0_259] : memref<1x64xf32, #tpu.memory_space<vmem>>, vector<1x64xf32>
    %696 = vector.broadcast %695 : vector<1x64xf32> to vector<8x64xf32>
    %697 = arith.mulf %688, %696 : vector<8x64xf32>
    %cst_260 = arith.constant dense<0.000000e+00> : vector<8xf32>
    %698 = vector.multi_reduction <add>, %697, %cst_260 [1] : vector<8x64xf32> to vector<8xf32>
    %699 = vector.shape_cast %698 : vector<8xf32> to vector<8x1xf32>
    %c0_261 = arith.constant 0 : index
    %c0_262 = arith.constant 0 : index
    %700 = vector.load %arg8[%c0_261, %c0_262] : memref<1x1xf32, #tpu.memory_space<vmem>>, vector<1x1xf32>
    %701 = vector.broadcast %700 : vector<1x1xf32> to vector<8x1xf32>
    %702 = arith.addf %699, %701 : vector<8x1xf32>
    %c0_263 = arith.constant 0 : index
    %c0_264 = arith.constant 0 : index
    %703 = vector.load %arg9[%c0_263, %c0_264] : memref<8x1xf32, #tpu.memory_space<vmem>>, vector<8x1xf32>
    tpu.vector_store %arg9[%c0_263, %c0_264], %702 {strides = array<i32>} : memref<8x1xf32, #tpu.memory_space<vmem>>, vector<8x1xf32>,
    return
  }
}

</mosaic_0001>

<bundles_post_ra>
// kernel: model_forward.1
= control target key start
LH: loop header
LB: loop body
LE: loop exit
PB: predicated region body
PF: predicated region fallthrough
CT: control target
= control target key end

     0   :  { %v2981_v3 = vmov 0.0   ;;  %vm78_vm0 = vcmask 130048   ;;  %v37_v39 = vlaneseq  ;;  %vm487_vm3 = vcmask 261120   ;;  %s3709_s1 = inlined_call_operand.vmem [shape: f32[16,256], index: 1, kind: input, shape index: {}]   ;;  %s3710_s2 = inlined_call_operand.vmem [shape: f32[64,256], index: 2, kind: input, shape index: {}]   ;;  %s3711_s0 = inlined_call_operand.vmem [shape: f32[64,16], index: 0, kind: input, shape index: {}]   ;;  %s3712_s3 = inlined_call_operand.vmem [shape: f32[1,256], index: 3, kind: input, shape index: {}]   ;;  %s3713_s4 = inlined_call_operand.vmem [shape: f32[64,256], index: 4, kind: input, shape index: {}]   ;;  %s3714_s5 = inlined_call_operand.vmem [shape: f32[64,256], index: 5, kind: input, shape index: {}]   ;;  %s3715_s10 = inlined_call_operand.vmem [shape: f32[2,8,64], index: 10, kind: output, shape index: {1}]   ;;  %s3716_s6 = inlined_call_operand.vmem [shape: f32[1,256], index: 6, kind: input, shape index: {}]   ;;  %s3717_s8 = inlined_call_operand.<no memory space> [shape: f32[1,1], index: 8, kind: input, shape index: {}]   ;;  %s3718_s7 = inlined_call_operand.vmem [shape: f32[1,64], index: 7, kind: input, shape index: {}]   ;;  %s3719_s11 = inlined_call_operand.vmem [shape: f32[2,8,64], index: 11, kind: output, shape index: {2}]   ;;  %s3720_s9 = inlined_call_operand.vmem [shape: f32[8,1], index: 9, kind: output, shape index: {0}]  }
   0x1   :  { %v75_v0 = vld [vmem:[%s3709_s1 + $0x8] sm:$0xff]  ;;  %v77_v1 = vld [vmem:[%s3709_s1 + $0x18] sm:$0xff]  ;;  %v74_v2 = vld [vmem:[%s3709_s1] sm:$0xff]  ;;  %167 = vmatprep.mubr.f32.mxu0 %v2981_v3  ;;  %450 = vmatprep.mubr.f32.mxu1 %v2981_v3  ;;  %vm490_vm4 = vcmask 523520   ;;  %vm382_vm5 = vcmask 523264   ;;  %vm2417_vm6 = vcmask 7168  }
   0x2   :  { %v2511_v4 = vpack.c.bf16 %v77_v1, %v75_v0  ;;  %v76_v5 = vld [vmem:[%s3709_s1 + $0x10] sm:$0xff]  ;;  %v365_v7 = vld [vmem:[%s3710_s2 + $0x8] sm:$0xff]  ;;  %v367_v8 = vld [vmem:[%s3710_s2 + $0x18] sm:$0xff]  ;;  %v38_v42 = vand.u32 127, %v37_v39  ;;  %v3189_v45 = vshrl.u32 %v37_v39, 7 }
   0x3   :  { %v2513_v6 = vpack.c.bf16 %v76_v5, %v74_v2  ;;  %v364_v9 = vld [vmem:[%s3710_s2] sm:$0xff]  ;;  %v366_v10 = vld [vmem:[%s3710_s2 + $0x10] sm:$0xff]  ;;  %v3072_v12 = vpack.c.bf16 %v367_v8, %v365_v7  ;;  %v369_v14 = vld [vmem:[%s3710_s2 + $0x28] sm:$0xff] }
   0x4   :  { %2512 = vmatprep.subr.bf16.mxu0 %v2511_v4  ;;  %v66_v11 = vld [vmem:[%s3711_s0] sm:$0xff]  ;;  %v3074_v13 = vpack.c.bf16 %v366_v10, %v364_v9  ;;  %v371_v15 = vld [vmem:[%s3710_s2 + $0x38] sm:$0xff]  ;;  %v370_v18 = vld [vmem:[%s3710_s2 + $0x30] sm:$0xff]  ;;  %v39_v46 = vadd.s32 128, %v38_v42  ;;  %v44_v49 = vand.u32 63, %v38_v42  ;;  %v248_v50 = vsub.s32 0, %v3189_v45 }
   0x5   :  { %2514 = vmatpush1.bf16.msra.mxu0 %v2513_v6  ;;  %v3082_v16 = vpack.c.bf16 %v371_v15, %v369_v14  ;;  %v368_v17 = vld [vmem:[%s3710_s2 + $0x20] sm:$0xff]  ;;  %2516 = vmatprep.subr.bf16.mxu1 %v3072_v12  ;;  %v373_v19 = vld [vmem:[%s3710_s2 + $0x48] sm:$0xff]  ;;  %v375_v20 = vld [vmem:[%s3710_s2 + $0x58] sm:$0xff]  ;;  %v252_v53 = vsub.s32 1, %v3189_v45 }
   0x6   :  { %2548 = vmatprep.subr.bf16.mxu0 %v3072_v12  ;;  %2518 = vmatpush1.bf16.msra.mxu1 %v3074_v13  ;;  %v3100_v21 = vpack.c.bf16 %v370_v18, %v368_v17  ;;  %v67_v22 = vld [vmem:[%s3711_s0 + $0x8] sm:$0xff]  ;;  %v3107_v23 = vpack.c.bf16 %v375_v20, %v373_v19  ;;  %v372_v24 = vld [vmem:[%s3710_s2 + $0x40] sm:$0xff]  ;;  %v374_v25 = vld [vmem:[%s3710_s2 + $0x50] sm:$0xff]  ;;  %v51_v51 = vand.u32 63, %v39_v46  ;;  %vm3196_vm1 = vcmp.lt.s32.totalorder %v44_v49, 32 }
   0x7   :  { %2520 = vmatprep.subr.bf16.mxu1 %v3082_v16  ;;  %v377_v26 = vld [vmem:[%s3710_s2 + $0x68] sm:$0xff]  ;;  %v379_v27 = vld [vmem:[%s3710_s2 + $0x78] sm:$0xff]  ;;  %v3125_v28 = vpack.c.bf16 %v374_v25, %v372_v24  ;;  %v68_v29 = vld [vmem:[%s3711_s0 + $0x10] sm:$0xff] }
   0x8   :  { %2445 = vmatmul.mubr.msk.f32.vlgmr.msra.gmra.mrb[0].mxu0 %vm78_vm0, %v66_v11  ;;  %v3132_v30 = vpack.c.bf16 %v379_v27, %v377_v26  ;;  %v376_v31 = vld [vmem:[%s3710_s2 + $0x60] sm:$0xff]  ;;  %v378_v32 = vld [vmem:[%s3710_s2 + $0x70] sm:$0xff]  ;;  %v69_v34 = vld [vmem:[%s3711_s0 + $0x18] sm:$0xff]  ;;  %vm3202_vm2 = vcmp.lt.s32.totalorder %v51_v51, 32 }
   0x9   :  { %173 = vmatprep.mubr.f32.mxu0 %v2981_v3  ;;  %2550 = vmatpush1.bf16.msra.mxu0 %v3074_v13  ;;  %v3144_v33 = vpack.c.bf16 %v378_v32, %v376_v31  ;;  %v70_v35 = vld [vmem:[%s3711_s0 + $0x20] sm:$0xff]  ;;  %v71_v36 = vld [vmem:[%s3711_s0 + $0x28] sm:$0xff]  ;;  %v72_v37 = vld [vmem:[%s3711_s0 + $0x30] sm:$0xff] }
   0xa   :  { %2552 = vmatprep.subr.bf16.mxu0 %v3082_v16  ;;  %2522 = vmatpush1.bf16.msra.mxu1 %v3100_v21  ;;  %v73_v38 = vld [vmem:[%s3711_s0 + $0x38] sm:$0xff]  ;;  %v232_v52 = vld [vmem:[%s3712_s3] sm:$0x3]  ;;  %s2982_s3 = smov 64  }
   0xb   :  { %2524 = vmatprep.subr.bf16.mxu1 %v3107_v23  ;;  %v249_v57 = vrot.slane %v232_v52, %v248_v50  ;;  %v253_v60 = vrot.slane %v232_v52, %v252_v53 }
   0xc   :  { %2446 = vmatmul.mubr.msk.f32.gmra.mrb[2].mxu0 %vm78_vm0, %v67_v22 }
   0xd   :  { %179 = vmatprep.mubr.f32.mxu0 %v2981_v3  ;;  %2554 = vmatpush1.bf16.msra.mxu0 %v3100_v21 }
   0xe   :  { %2556 = vmatprep.subr.bf16.mxu0 %v3107_v23  ;;  %2526 = vmatpush1.bf16.msra.mxu1 %v3125_v28 }
   0xf   :  { %2528 = vmatprep.subr.bf16.mxu1 %v3132_v30 }
  0x10   :  { %2447 = vmatmul.mubr.msk.f32.gmra.mrb[4].mxu0 %vm78_vm0, %v68_v29 }
  0x11   :  { %185 = vmatprep.mubr.f32.mxu0 %v2981_v3  ;;  %2558 = vmatpush1.bf16.msra.mxu0 %v3125_v28 }
  0x12   :  { %2560 = vmatprep.subr.bf16.mxu0 %v3132_v30  ;;  %2530 = vmatpush1.bf16.msra.mxu1 %v3144_v33 }
  0x13   :  { %2532 = vmatprep.subr.bf16.mxu1 %v3072_v12 }
  0x14   :  { %2448 = vmatmul.mubr.msk.f32.gmra.mrb[6].mxu0 %vm78_vm0, %v69_v34 }
  0x15   :  { %191 = vmatprep.mubr.f32.mxu0 %v2981_v3  ;;  %2562 = vmatpush1.bf16.msra.mxu0 %v3144_v33 }
  0x16   :  { %451 = vmatmul.mubr.f32.vlgmr.msra.gmra.mrb[0].mxu1 %v2981_v3  ;;  %2580 = vmatprep.subr.bf16.mxu0 %v3072_v12 }
  0x17   :  { %2534 = vmatpush1.bf16.msra.mxu1 %v3074_v13  ;;  %561 = vmatprep.mubr.f32.mxu1 %v2981_v3 }
  0x18   :  { %2449 = vmatmul.mubr.msk.f32.gmra.mrb[8].mxu0 %vm78_vm0, %v70_v35  ;;  %2536 = vmatprep.subr.bf16.mxu1 %v3082_v16 }
  0x19   :  { %197 = vmatprep.mubr.f32.mxu0 %v2981_v3 }
  0x1b   :  { %2538 = vmatpush1.bf16.msra.mxu1 %v3100_v21 }
  0x1c   :  { %2450 = vmatmul.mubr.msk.f32.gmra.mrb[10].mxu0 %vm78_vm0, %v71_v36  ;;  %2540 = vmatprep.subr.bf16.mxu1 %v3107_v23 }
  0x1d   :  { %203 = vmatprep.mubr.f32.mxu0 %v2981_v3 }
  0x1f   :  { %2542 = vmatpush1.bf16.msra.mxu1 %v3125_v28 }
  0x20   :  { %2451 = vmatmul.mubr.msk.f32.gmra.mrb[12].mxu0 %vm78_vm0, %v72_v37  ;;  %2544 = vmatprep.subr.bf16.mxu1 %v3132_v30 }
  0x21   :  { %209 = vmatprep.mubr.f32.mxu0 %v2981_v3 }
  0x23   :  { %2546 = vmatpush1.bf16.msra.mxu1 %v3144_v33 }
  0x24   :  { %2452 = vmatmul.mubr.msk.f32.gmra.mrb[14].mxu0 %vm78_vm0, %v73_v38  ;;  %2564 = vmatprep.subr.bf16.mxu1 %v3072_v12 }
  0x25   :  { %671 = vmatprep.mubr.f32.mxu0 %v2981_v3 }
  0xdb   :  { %v169_v40 = vpop.f32.mrb[0].mxu0 }
  0xdc   :  { %v171_v41 = vpop.f32.mrb[1].mxu0 }
  0xdf   :  { %v175_v43 = vpop.f32.mrb[2].mxu0 }
  0xe0   :  { %v177_v44 = vpop.f32.mrb[3].mxu0 }
  0xe3   :  { %v181_v47 = vpop.f32.mrb[4].mxu0 }
  0xe4   :  { %v183_v48 = vpop.f32.mrb[5].mxu0 }
  0xe7   :  { %v187_v54 = vpop.f32.mrb[6].mxu0 }
  0xe8   :  { %v189_v55 = vpop.f32.mrb[7].mxu0 }
  0xe9   :  { %v452_v59 = vpop.f32.mrb[0].mxu1 }
  0xea   :  { %v454_v62 = vpop.f32.mrb[1].mxu1 }
  0xeb   :  { %v193_v61 = vpop.f32.mrb[8].mxu0 }
  0xec   :  { %v308_v63 = vsel %vm3196_vm1, %v187_v54, %v193_v61  ;;  %v320_v0 = vsel %vm3196_vm1, %v193_v61, %v187_v54  ;;  %v195_v1 = vpop.f32.mrb[9].mxu0 }
  0xed   :  { %v309_v2 = vsel %vm3202_vm2, %v189_v55, %v195_v1  ;;  %v321_v4 = vsel %vm3202_vm2, %v195_v1, %v189_v55  ;;  %v3216_v5 = vadd.f32 %v308_v63, %v249_v57  ;;  %v3218_v6 = vadd.f32 %v320_v0, %v249_v57 }
  0xee   :  { %v3220_v7 = vadd.f32 %v309_v2, %v253_v60  ;;  %v3222_v8 = vadd.f32 %v321_v4, %v253_v60 }
  0xef   :  { %v199_v9 = vpop.f32.mrb[10].mxu0 }
  0xf0   :  { %v290_v10 = vsel %vm3196_vm1, %v181_v47, %v199_v9  ;;  %v332_v11 = vsel %vm3196_vm1, %v199_v9, %v181_v47  ;;  %v201_v14 = vpop.f32.mrb[11].mxu0 }
  0xf1   :  { %v291_v15 = vsel %vm3202_vm2, %v183_v48, %v201_v14  ;;  %v333_v17 = vsel %vm3202_vm2, %v201_v14, %v183_v48  ;;  %v3232_v18 = vadd.f32 %v290_v10, %v249_v57  ;;  %v3234_v19 = vadd.f32 %v332_v11, %v249_v57 }
  0xf2   :  { %v3236_v20 = vadd.f32 %v291_v15, %v253_v60  ;;  %v3238_v22 = vadd.f32 %v333_v17, %v253_v60 }
  0xf3   :  { %v205_v24 = vpop.f32.mrb[12].mxu0 }
  0xf4   :  { %v272_v25 = vsel %vm3196_vm1, %v175_v43, %v205_v24  ;;  %v344_v26 = vsel %vm3196_vm1, %v205_v24, %v175_v43  ;;  %v207_v27 = vpop.f32.mrb[13].mxu0 }
  0xf5   :  { %v273_v29 = vsel %vm3202_vm2, %v177_v44, %v207_v27  ;;  %v345_v31 = vsel %vm3202_vm2, %v207_v27, %v177_v44  ;;  %v274_v32 = vadd.f32 %v272_v25, %v249_v57  ;;  %v3248_v34 = vadd.f32 %v344_v26, %v249_v57 }
  0xf6   :  { %v275_v35 = vadd.f32 %v273_v29, %v253_v60  ;;  %v3250_v36 = vadd.f32 %v345_v31, %v253_v60 }
  0xf7   :  { %v211_v37 = vpop.f32.mrb[14].mxu0 }
  0xf8   :  { %v243_v38 = vsel %vm3196_vm1, %v169_v40, %v211_v37  ;;  %v356_v39 = vsel %vm3196_vm1, %v211_v37, %v169_v40  ;;  %v213_v42 = vpop.f32.mrb[15].mxu0 }
  0xf9   :  { %v244_v43 = vsel %vm3202_vm2, %v171_v41, %v213_v42  ;;  %v357_v44 = vsel %vm3202_vm2, %v213_v42, %v171_v41  ;;  %v256_v46 = vadd.f32 %v249_v57, %v243_v38  ;;  %v3260_v47 = vadd.f32 %v356_v39, %v249_v57 }
  0xfa   :  { %v257_v48 = vadd.f32 %v253_v60, %v244_v43  ;;  %v3262_v49 = vadd.f32 %v357_v44, %v253_v60 }
  0xfb   :  { %v453_v51 = vadd.f32 %v452_v59, %v256_v46 }
  0xfc   :  { %v455_v52 = vadd.f32 %v454_v62, %v257_v48 }
  0xfd   :  { %v2453_v40 = vmul.f32 -1.442695, %v453_v51 }
  0xfe   :  { %2789 = vtanh.f32 %v455_v52  ;;  %v2454_v62 = vmul.f32 -1.442695, %v455_v52 }
  0xff   :  { %2791 = vpow2.f32 %v2453_v40 }
 0x108   :  { %v2790_v54 = vpop.eup %2789 }
 0x109   :  { %472 = vrot.lane.b32.xlu0 %v2790_v54, %s2982_s3  ;;  %v2792_v55 = vpop.eup %2791 }
 0x10a   :  { %v463_v61 = vadd.f32 1.0, %v2792_v55 }
 0x10c   :  { %2793 = vrcp.f32 %v463_v61 }
 0x116   :  { %v2794_v63 = vpop.eup %2793 }
 0x117   :  { %v470_v57 = vmul.f32 0.0, %v2794_v63 }
 0x17b   :  { %v473_v41 = vpop.permute.xlu0 %472 }
 0x17c   :  { %v475_v0 = vmul.f32 %v2794_v63, %v473_v41 }
 0x17e   :  { %477 = vrot.lane.b32.xlu0 %v475_v0, %s2982_s3 }
 0x1f0   :  { %v478_v60 = vpop.permute.xlu0 %477 }
 0x1f1   :  { %v480_v1 = vadd.f32 %v478_v60, %v470_v57 }
 0x1f3   :  { %2795 = vtanh.f32 %v480_v1 }
 0x1f4   :  { %2797 = vpow2.f32 %v2454_v62 }
 0x1fd   :  { %v2796_v59 = vpop.eup %2795 }
 0x1fe   :  { %483 = vrot.lane.b32.xlu1 %v2796_v59, %s2982_s3  ;;  %v2798_v2 = vpop.eup %2797 }
 0x1ff   :  { %v464_v4 = vadd.f32 1.0, %v2798_v2 }
 0x201   :  { %2799 = vrcp.f32 %v464_v4 }
 0x20b   :  { %v2800_v9 = vpop.eup %2799 }
 0x270   :  { %v484_v10 = vpop.permute.xlu1 %483 }
 0x271   :  { %v486_v11 = vmul.f32 %v2800_v9, %v484_v10 }
 0x273   :  { %488 = vst.msk [vmem:[#allocation4] sm:$0xff] %vm487_vm3, %v486_v11  ;;  %2455 = vmatmul.mubr.msk.f32.vlgmr.msra.gmra.mrb[2].mxu1 %vm382_vm5, %v486_v11 }
 0x274   :  { %491 = vst.msk [vmem:[#allocation4 + $0x38] sm:$0xff] %vm490_vm4, %v486_v11  ;;  %2566 = vmatpush1.bf16.msra.mxu1 %v3074_v13  ;;  %781 = vmatprep.mubr.f32.mxu1 %v2981_v3 }
 0x275   :  { %2568 = vmatprep.subr.bf16.mxu1 %v3082_v16 }
 0x278   :  { %2570 = vmatpush1.bf16.msra.mxu1 %v3100_v21 }
 0x279   :  { %2572 = vmatprep.subr.bf16.mxu1 %v3107_v23 }
 0x27c   :  { %2574 = vmatpush1.bf16.msra.mxu1 %v3125_v28 }
 0x27d   :  { %2576 = vmatprep.subr.bf16.mxu1 %v3132_v30 }
 0x280   :  { %2578 = vmatpush1.bf16.msra.mxu1 %v3144_v33 }
 0x281   :  { %2596 = vmatprep.subr.bf16.mxu1 %v3072_v12 }
 0x346   :  { %v563_v14 = vpop.f32.mrb[2].mxu1 }
 0x347   :  { %v564_v15 = vadd.f32 %v563_v14, %v274_v32  ;;  %v565_v17 = vpop.f32.mrb[3].mxu1 }
 0x348   :  { %v566_v24 = vadd.f32 %v565_v17, %v275_v35 }
 0x349   :  { %v2456_v26 = vmul.f32 -1.442695, %v564_v15 }
 0x34a   :  { %2801 = vtanh.f32 %v566_v24  ;;  %v2457_v35 = vmul.f32 -1.442695, %v566_v24 }
 0x34b   :  { %2803 = vpow2.f32 %v2456_v26 }
 0x354   :  { %v2802_v25 = vpop.eup %2801 }
 0x355   :  { %583 = vrot.lane.b32.xlu1 %v2802_v25, %s2982_s3  ;;  %v2804_v27 = vpop.eup %2803 }
 0x356   :  { %v574_v29 = vadd.f32 1.0, %v2804_v27 }
 0x358   :  { %2805 = vrcp.f32 %v574_v29 }
 0x362   :  { %v2806_v31 = vpop.eup %2805 }
 0x363   :  { %v581_v39 = vmul.f32 %v2806_v31, %v480_v1 }
 0x3c7   :  { %v584_v37 = vpop.permute.xlu1 %583 }
 0x3c8   :  { %v586_v38 = vmul.f32 %v2806_v31, %v584_v37 }
 0x3ca   :  { %588 = vrot.lane.b32.xlu0 %v586_v38, %s2982_s3 }
 0x43c   :  { %v589_v42 = vpop.permute.xlu0 %588 }
 0x43d   :  { %v591_v43 = vadd.f32 %v589_v42, %v581_v39 }
 0x43f   :  { %2807 = vtanh.f32 %v591_v43 }
 0x440   :  { %2809 = vpow2.f32 %v2457_v35 }
 0x449   :  { %v2808_v32 = vpop.eup %2807 }
 0x44a   :  { %594 = vrot.lane.b32.xlu1 %v2808_v32, %s2982_s3  ;;  %v2810_v44 = vpop.eup %2809 }
 0x44b   :  { %v575_v46 = vadd.f32 1.0, %v2810_v44 }
 0x44d   :  { %2811 = vrcp.f32 %v575_v46 }
 0x457   :  { %v2812_v48 = vpop.eup %2811 }
 0x4bc   :  { %v595_v51 = vpop.permute.xlu1 %594 }
 0x4bd   :  { %v597_v52 = vmul.f32 %v2812_v48, %v595_v51 }
 0x4bf   :  { %599 = vst.msk [vmem:[#allocation4 + $0x8] sm:$0xff] %vm487_vm3, %v597_v52  ;;  %2458 = vmatmul.mubr.msk.f32.vlgmr.msra.gmra.mrb[16].mxu0 %vm382_vm5, %v597_v52 }
 0x4c0   :  { %601 = vst.msk [vmem:[#allocation4 + $0x30] sm:$0xff] %vm490_vm4, %v597_v52  ;;  %2582 = vmatpush1.bf16.msra.mxu0 %v3074_v13  ;;  %891 = vmatprep.mubr.f32.mxu0 %v2981_v3 }
 0x4c1   :  { %2584 = vmatprep.subr.bf16.mxu0 %v3082_v16 }
 0x4c4   :  { %2586 = vmatpush1.bf16.msra.mxu0 %v3100_v21 }
 0x4c5   :  { %2588 = vmatprep.subr.bf16.mxu0 %v3107_v23 }
 0x4c8   :  { %2590 = vmatpush1.bf16.msra.mxu0 %v3125_v28 }
 0x4c9   :  { %2592 = vmatprep.subr.bf16.mxu0 %v3132_v30 }
 0x4cc   :  { %2594 = vmatpush1.bf16.msra.mxu0 %v3144_v33 }
 0x4cd   :  { %2612 = vmatprep.subr.bf16.mxu0 %v3072_v12 }
 0x592   :  { %v673_v54 = vpop.f32.mrb[16].mxu0 }
 0x593   :  { %v674_v40 = vadd.f32 %v673_v54, %v3232_v18  ;;  %v675_v55 = vpop.f32.mrb[17].mxu0 }
 0x594   :  { %v676_v61 = vadd.f32 %v675_v55, %v3236_v20 }
 0x595   :  { %v2459_v41 = vmul.f32 -1.442695, %v674_v40 }
 0x596   :  { %2813 = vtanh.f32 %v676_v61  ;;  %v2460_v20 = vmul.f32 -1.442695, %v676_v61 }
 0x597   :  { %2815 = vpow2.f32 %v2459_v41 }
 0x5a0   :  { %v2814_v63 = vpop.eup %2813 }
 0x5a1   :  { %693 = vrot.lane.b32.xlu0 %v2814_v63, %s2982_s3  ;;  %v2816_v0 = vpop.eup %2815 }
 0x5a2   :  { %v684_v57 = vadd.f32 1.0, %v2816_v0 }
 0x5a4   :  { %2817 = vrcp.f32 %v684_v57 }
 0x5ae   :  { %v2818_v60 = vpop.eup %2817 }
 0x5af   :  { %v691_v62 = vmul.f32 %v2818_v60, %v591_v43 }
 0x613   :  { %v694_v1 = vpop.permute.xlu0 %693 }
 0x614   :  { %v696_v59 = vmul.f32 %v2818_v60, %v694_v1 }
 0x616   :  { %698 = vrot.lane.b32.xlu1 %v696_v59, %s2982_s3 }
 0x688   :  { %v699_v2 = vpop.permute.xlu1 %698 }
 0x689   :  { %v701_v18 = vadd.f32 %v699_v2, %v691_v62 }
 0x68b   :  { %2819 = vtanh.f32 %v701_v18 }
 0x68c   :  { %2821 = vpow2.f32 %v2460_v20 }
 0x695   :  { %v2820_v4 = vpop.eup %2819 }
 0x696   :  { %704 = vrot.lane.b32.xlu0 %v2820_v4, %s2982_s3  ;;  %v2822_v9 = vpop.eup %2821 }
 0x697   :  { %v685_v10 = vadd.f32 1.0, %v2822_v9 }
 0x699   :  { %2823 = vrcp.f32 %v685_v10 }
 0x6a3   :  { %v2824_v11 = vpop.eup %2823 }
 0x708   :  { %v705_v14 = vpop.permute.xlu0 %704 }
 0x709   :  { %v707_v15 = vmul.f32 %v2824_v11, %v705_v14 }
 0x70b   :  { %709 = vst.msk [vmem:[#allocation4 + $0x10] sm:$0xff] %vm487_vm3, %v707_v15  ;;  %2461 = vmatmul.mubr.msk.f32.vlgmr.msra.gmra.mrb[4].mxu1 %vm382_vm5, %v707_v15 }
 0x70c   :  { %711 = vst.msk [vmem:[#allocation4 + $0x28] sm:$0xff] %vm490_vm4, %v707_v15  ;;  %2598 = vmatpush1.bf16.msra.mxu1 %v3074_v13  ;;  %999 = vmatprep.mubr.f32.mxu1 %v2981_v3 }
 0x70d   :  { %2600 = vmatprep.subr.bf16.mxu1 %v3082_v16 }
 0x710   :  { %2602 = vmatpush1.bf16.msra.mxu1 %v3100_v21 }
 0x711   :  { %2604 = vmatprep.subr.bf16.mxu1 %v3107_v23 }
 0x714   :  { %2606 = vmatpush1.bf16.msra.mxu1 %v3125_v28 }
 0x715   :  { %2608 = vmatprep.subr.bf16.mxu1 %v3132_v30 }
 0x718   :  { %2610 = vmatpush1.bf16.msra.mxu1 %v3144_v33 }
 0x719   :  { %2628 = vmatprep.subr.bf16.mxu1 %v3072_v12 }
 0x7de   :  { %v783_v17 = vpop.f32.mrb[4].mxu1 }
 0x7df   :  { %v784_v24 = vadd.f32 %v783_v17, %v3216_v5  ;;  %v785_v25 = vpop.f32.mrb[5].mxu1 }
 0x7e0   :  { %v786_v26 = vadd.f32 %v785_v25, %v3220_v7 }
 0x7e1   :  { %v2462_v29 = vmul.f32 -1.442695, %v784_v24 }
 0x7e2   :  { %2825 = vtanh.f32 %v786_v26  ;;  %v2463_v7 = vmul.f32 -1.442695, %v786_v26 }
 0x7e3   :  { %2827 = vpow2.f32 %v2462_v29 }
 0x7ec   :  { %v2826_v27 = vpop.eup %2825 }
 0x7ed   :  { %803 = vrot.lane.b32.xlu1 %v2826_v27, %s2982_s3  ;;  %v2828_v31 = vpop.eup %2827 }
 0x7ee   :  { %v794_v37 = vadd.f32 1.0, %v2828_v31 }
 0x7f0   :  { %2829 = vrcp.f32 %v794_v37 }
 0x7fa   :  { %v2830_v38 = vpop.eup %2829 }
 0x7fb   :  { %v801_v12 = vmul.f32 %v2830_v38, %v701_v18 }
 0x85f   :  { %v804_v39 = vpop.permute.xlu1 %803 }
 0x860   :  { %v806_v42 = vmul.f32 %v2830_v38, %v804_v39 }
 0x862   :  { %808 = vrot.lane.b32.xlu0 %v806_v42, %s2982_s3 }
 0x8d4   :  { %v809_v43 = vpop.permute.xlu0 %808 }
 0x8d5   :  { %v811_v5 = vadd.f32 %v809_v43, %v801_v12 }
 0x8d7   :  { %2831 = vtanh.f32 %v811_v5 }
 0x8d8   :  { %2833 = vpow2.f32 %v2463_v7 }
 0x8e1   :  { %v2832_v32 = vpop.eup %2831 }
 0x8e2   :  { %814 = vrot.lane.b32.xlu1 %v2832_v32, %s2982_s3  ;;  %v2834_v35 = vpop.eup %2833 }
 0x8e3   :  { %v795_v44 = vadd.f32 1.0, %v2834_v35 }
 0x8e5   :  { %2835 = vrcp.f32 %v795_v44 }
 0x8ef   :  { %v2836_v46 = vpop.eup %2835 }
 0x954   :  { %v815_v48 = vpop.permute.xlu1 %814 }
 0x955   :  { %v817_v51 = vmul.f32 %v2836_v46, %v815_v48 }
 0x957   :  { %819 = vst.msk [vmem:[#allocation4 + $0x18] sm:$0xff] %vm487_vm3, %v817_v51  ;;  %2464 = vmatmul.mubr.msk.f32.vlgmr.msra.gmra.mrb[18].mxu0 %vm382_vm5, %v817_v51 }
 0x958   :  { %821 = vst.msk [vmem:[#allocation4 + $0x20] sm:$0xff] %vm490_vm4, %v817_v51  ;;  %2614 = vmatpush1.bf16.msra.mxu0 %v3074_v13  ;;  %1107 = vmatprep.mubr.f32.mxu0 %v2981_v3 }
 0x959   :  { %2616 = vmatprep.subr.bf16.mxu0 %v3082_v16 }
 0x95c   :  { %2618 = vmatpush1.bf16.msra.mxu0 %v3100_v21 }
 0x95d   :  { %2620 = vmatprep.subr.bf16.mxu0 %v3107_v23 }
 0x960   :  { %2622 = vmatpush1.bf16.msra.mxu0 %v3125_v28 }
 0x961   :  { %2624 = vmatprep.subr.bf16.mxu0 %v3132_v30 }
 0x964   :  { %2626 = vmatpush1.bf16.msra.mxu0 %v3144_v33 }
 0xa2a   :  { %v893_v52 = vpop.f32.mrb[18].mxu0 }
 0xa2b   :  { %v894_v54 = vadd.f32 %v893_v52, %v3218_v6  ;;  %v895_v40 = vpop.f32.mrb[19].mxu0 }
 0xa2c   :  { %v896_v55 = vadd.f32 %v895_v40, %v3222_v8 }
 0xa2d   :  { %v2465_v63 = vmul.f32 -1.442695, %v894_v54 }
 0xa2e   :  { %2837 = vtanh.f32 %v896_v55  ;;  %v2466_v8 = vmul.f32 -1.442695, %v896_v55 }
 0xa2f   :  { %2839 = vpow2.f32 %v2465_v63 }
 0xa38   :  { %v2838_v61 = vpop.eup %2837 }
 0xa39   :  { %913 = vrot.lane.b32.xlu0 %v2838_v61, %s2982_s3  ;;  %v2840_v41 = vpop.eup %2839 }
 0xa3a   :  { %v904_v0 = vadd.f32 1.0, %v2840_v41 }
 0xa3c   :  { %2841 = vrcp.f32 %v904_v0 }
 0xa46   :  { %v2842_v57 = vpop.eup %2841 }
 0xa47   :  { %v911_v59 = vmul.f32 %v2842_v57, %v811_v5 }
 0xaab   :  { %v914_v60 = vpop.permute.xlu0 %913 }
 0xaac   :  { %v916_v1 = vmul.f32 %v2842_v57, %v914_v60 }
 0xaae   :  { %918 = vrot.lane.b32.xlu1 %v916_v1, %s2982_s3 }
 0xb20   :  { %v919_v62 = vpop.permute.xlu1 %918 }
 0xb21   :  { %v921_v6 = vadd.f32 %v919_v62, %v911_v59 }
 0xb23   :  { %2843 = vtanh.f32 %v921_v6 }
 0xb24   :  { %2845 = vpow2.f32 %v2466_v8 }
 0xb2d   :  { %v2844_v2 = vpop.eup %2843 }
 0xb2e   :  { %924 = vrot.lane.b32.xlu0 %v2844_v2, %s2982_s3  ;;  %v2846_v18 = vpop.eup %2845 }
 0xb2f   :  { %v905_v4 = vadd.f32 1.0, %v2846_v18 }
 0xb31   :  { %2847 = vrcp.f32 %v905_v4 }
 0xb3b   :  { %v2848_v20 = vpop.eup %2847 }
 0xba0   :  { %v925_v9 = vpop.permute.xlu0 %924 }
 0xba1   :  { %v927_v10 = vmul.f32 %v2848_v20, %v925_v9  ;;  %v1268_v20 = vld [vmem:[%s3713_s4] sm:$0xff] }
 0xba3   :  { %928 = vst.msk [vmem:[#allocation4 + $0x20] sm:$0xff] %vm487_vm3, %v927_v10  ;;  %2467 = vmatmul.mubr.msk.f32.vlgmr.msra.gmra.mrb[6].mxu1 %vm382_vm5, %v927_v10 }
 0xba4   :  { %929 = vst.msk [vmem:[#allocation4 + $0x18] sm:$0xff] %vm490_vm4, %v927_v10  ;;  %2630 = vmatpush1.bf16.msra.mxu1 %v3074_v13  ;;  %1215 = vmatprep.mubr.f32.mxu1 %v2981_v3  ;;  %v1270_v10 = vld [vmem:[%s3713_s4 + $0x10] sm:$0xff] }
 0xba5   :  { %2632 = vmatprep.subr.bf16.mxu1 %v3082_v16 }
 0xba8   :  { %2634 = vmatpush1.bf16.msra.mxu1 %v3100_v21 }
 0xba9   :  { %2636 = vmatprep.subr.bf16.mxu1 %v3107_v23 }
 0xbac   :  { %2638 = vmatpush1.bf16.msra.mxu1 %v3125_v28 }
 0xbad   :  { %2640 = vmatprep.subr.bf16.mxu1 %v3132_v30 }
 0xbb0   :  { %2642 = vmatpush1.bf16.msra.mxu1 %v3144_v33 }
 0xc76   :  { %v1001_v11 = vpop.f32.mrb[6].mxu1 }
 0xc77   :  { %v1002_v14 = vadd.f32 %v1001_v11, %v3234_v19  ;;  %v1003_v15 = vpop.f32.mrb[7].mxu1  ;;  %v1273_v11 = vld [vmem:[%s3713_s4 + $0x28] sm:$0xff] }
 0xc78   :  { %v1004_v13 = vadd.f32 %v1003_v15, %v3238_v22  ;;  %v2645_v15 = vpack.c.bf16 %v1270_v10, %v1268_v20  ;;  %v1264_v10 = vld [vmem:[#allocation4 + $0x20] sm:$0xff] }
 0xc79   :  { %v2468_v16 = vmul.f32 -1.442695, %v1002_v14  ;;  %v1275_v14 = vld [vmem:[%s3713_s4 + $0x38] sm:$0xff] }
 0xc7a   :  { %2849 = vtanh.f32 %v1004_v13  ;;  %v2469_v22 = vmul.f32 -1.442695, %v1004_v13  ;;  %v2647_v13 = vpack.c.bf16 %v1275_v14, %v1273_v11 }
 0xc7b   :  { %2851 = vpow2.f32 %v2468_v16  ;;  %v1274_v16 = vld [vmem:[%s3713_s4 + $0x30] sm:$0xff] }
 0xc84   :  { %v2850_v17 = vpop.eup %2849 }
 0xc85   :  { %1021 = vrot.lane.b32.xlu1 %v2850_v17, %s2982_s3  ;;  %v2852_v21 = vpop.eup %2851  ;;  %v1272_v17 = vld [vmem:[%s3713_s4 + $0x20] sm:$0xff] }
 0xc86   :  { %v1012_v23 = vadd.f32 1.0, %v2852_v21  ;;  %v2649_v21 = vpack.c.bf16 %v1274_v16, %v1272_v17 }
 0xc88   :  { %2853 = vrcp.f32 %v1012_v23 }
 0xc92   :  { %v2854_v28 = vpop.eup %2853 }
 0xc93   :  { %v1019_v33 = vmul.f32 %v2854_v28, %v921_v6 }
 0xcf7   :  { %v1022_v24 = vpop.permute.xlu1 %1021 }
 0xcf8   :  { %v1024_v30 = vmul.f32 %v2854_v28, %v1022_v24  ;;  %v1277_v24 = vld [vmem:[%s3713_s4 + $0x48] sm:$0xff] }
 0xcfa   :  { %1026 = vrot.lane.b32.xlu0 %v1024_v30, %s2982_s3  ;;  %v1279_v30 = vld [vmem:[%s3713_s4 + $0x58] sm:$0xff] }
 0xd6c   :  { %v1027_v25 = vpop.permute.xlu0 %1026 }
 0xd6d   :  { %v1029_v19 = vadd.f32 %v1027_v25, %v1019_v33  ;;  %v2651_v25 = vpack.c.bf16 %v1279_v30, %v1277_v24 }
 0xd6f   :  { %2855 = vtanh.f32 %v1029_v19 }
 0xd70   :  { %2857 = vpow2.f32 %v2469_v22 }
 0xd79   :  { %v2856_v26 = vpop.eup %2855 }
 0xd7a   :  { %1032 = vrot.lane.b32.xlu1 %v2856_v26, %s2982_s3  ;;  %v2858_v27 = vpop.eup %2857  ;;  %v1278_v26 = vld [vmem:[%s3713_s4 + $0x50] sm:$0xff] }
 0xd7b   :  { %v1013_v29 = vadd.f32 1.0, %v2858_v27  ;;  %v1281_v27 = vld [vmem:[%s3713_s4 + $0x68] sm:$0xff] }
 0xd7d   :  { %2859 = vrcp.f32 %v1013_v29  ;;  %v1283_v29 = vld [vmem:[%s3713_s4 + $0x78] sm:$0xff] }
 0xd87   :  { %v2860_v31 = vpop.eup %2859 }
 0xdec   :  { %v1033_v37 = vpop.permute.xlu1 %1032 }
 0xded   :  { %v1035_v38 = vmul.f32 %v2860_v31, %v1033_v37  ;;  %v1280_v31 = vld [vmem:[%s3713_s4 + $0x60] sm:$0xff]  ;;  %v2655_v37 = vpack.c.bf16 %v1283_v29, %v1281_v27 }
 0xdef   :  { %1036 = vst.msk [vmem:[#allocation4 + $0x28] sm:$0xff] %vm487_vm3, %v1035_v38  ;;  %2470 = vmatmul.mubr.msk.f32.vlgmr.msra.gmra.mrb[20].mxu0 %vm382_vm5, %v1035_v38 }
 0xdf0   :  { %1037 = vst.msk [vmem:[#allocation4 + $0x10] sm:$0xff] %vm490_vm4, %v1035_v38  ;;  %1372 = vmatprep.mubr.f32.mxu0 %v2981_v3  ;;  %v1282_v38 = vld [vmem:[%s3713_s4 + $0x70] sm:$0xff] }
 0xdf6   :  { %v1265_v11 = vld [vmem:[#allocation4 + $0x28] sm:$0xff] }
 0xdf7   :  { %v1262_v20 = vld [vmem:[#allocation4 + $0x10] sm:$0xff] }
 0xec2   :  { %v1109_v39 = vpop.f32.mrb[20].mxu0 }
 0xec3   :  { %v1110_v42 = vadd.f32 %v1109_v39, %v3248_v34  ;;  %v1111_v12 = vpop.f32.mrb[21].mxu0  ;;  %v2657_v39 = vpack.c.bf16 %v1282_v38, %v1280_v31 }
 0xec4   :  { %v1112_v43 = vadd.f32 %v1111_v12, %v3250_v36  ;;  %v1530_v12 = vld [vmem:[%s3714_s5 + $0x8] sm:$0xff] }
 0xec5   :  { %v2471_v32 = vmul.f32 -1.442695, %v1110_v42 }
 0xec6   :  { %2861 = vtanh.f32 %v1112_v43  ;;  %v2472_v36 = vmul.f32 -1.442695, %v1112_v43  ;;  %v1532_v43 = vld [vmem:[%s3714_s5 + $0x18] sm:$0xff] }
 0xec7   :  { %2863 = vpow2.f32 %v2471_v32  ;;  %v1529_v32 = vld [vmem:[%s3714_s5] sm:$0xff] }
 0xed0   :  { %v2862_v5 = vpop.eup %2861 }
 0xed1   :  { %1129 = vrot.lane.b32.xlu0 %v2862_v5, %s2982_s3  ;;  %v2864_v7 = vpop.eup %2863  ;;  %v3426_v5 = vpack.c.bf16 %v1532_v43, %v1530_v12 }
 0xed2   :  { %v1120_v35 = vadd.f32 1.0, %v2864_v7  ;;  %v1531_v7 = vld [vmem:[%s3714_s5 + $0x10] sm:$0xff] }
 0xed3   :  { %2660 = vmatprep.subr.bf16.mxu1 %v3426_v5 }
 0xed4   :  { %2865 = vrcp.f32 %v1120_v35  ;;  %v3434_v35 = vpack.c.bf16 %v1531_v7, %v1529_v32 }
 0xede   :  { %v2866_v44 = vpop.eup %2865 }
 0xedf   :  { %v1127_v51 = vmul.f32 %v2866_v44, %v1029_v19  ;;  %v1276_v19 = vld [vmem:[%s3713_s4 + $0x40] sm:$0xff] }
 0xee0   :  { %v2653_v22 = vpack.c.bf16 %v1278_v26, %v1276_v19 }
 0xf43   :  { %v1130_v46 = vpop.permute.xlu0 %1129 }
 0xf44   :  { %v1132_v48 = vmul.f32 %v2866_v44, %v1130_v46  ;;  %v1534_v44 = vld [vmem:[%s3714_s5 + $0x28] sm:$0xff]  ;;  %v1536_v46 = vld [vmem:[%s3714_s5 + $0x38] sm:$0xff] }
 0xf46   :  { %1134 = vrot.lane.b32.xlu1 %v1132_v48, %s2982_s3  ;;  %v3445_v48 = vpack.c.bf16 %v1536_v46, %v1534_v44 }
 0xfb8   :  { %v1135_v52 = vpop.permute.xlu1 %1134 }
 0xfb9   :  { %v1137_v34 = vadd.f32 %v1135_v52, %v1127_v51  ;;  %v1533_v51 = vld [vmem:[%s3714_s5 + $0x20] sm:$0xff]  ;;  %v1535_v52 = vld [vmem:[%s3714_s5 + $0x30] sm:$0xff] }
 0xfbb   :  { %2867 = vtanh.f32 %v1137_v34 }
 0xfbc   :  { %2869 = vpow2.f32 %v2472_v36  ;;  %v1540_v36 = vld [vmem:[%s3714_s5 + $0x58] sm:$0xff] }
 0xfc5   :  { %v2868_v54 = vpop.eup %2867 }
 0xfc6   :  { %1140 = vrot.lane.b32.xlu0 %v2868_v54, %s2982_s3  ;;  %v2870_v40 = vpop.eup %2869  ;;  %v1538_v54 = vld [vmem:[%s3714_s5 + $0x48] sm:$0xff] }
 0xfc7   :  { %v1121_v55 = vadd.f32 1.0, %v2870_v40  ;;  %v3463_v40 = vpack.c.bf16 %v1540_v36, %v1538_v54 }
 0xfc9   :  { %2871 = vrcp.f32 %v1121_v55  ;;  %v1537_v55 = vld [vmem:[%s3714_s5 + $0x40] sm:$0xff] }
 0xfd3   :  { %v2872_v61 = vpop.eup %2871 }
0x1038   :  { %v1141_v63 = vpop.permute.xlu0 %1140 }
0x1039   :  { %v1143_v41 = vmul.f32 %v2872_v61, %v1141_v63  ;;  %v1539_v61 = vld [vmem:[%s3714_s5 + $0x50] sm:$0xff] }
0x103a   :  { %v3471_v63 = vpack.c.bf16 %v1539_v61, %v1537_v55 }
0x103b   :  { %1144 = vst.msk [vmem:[#allocation4 + $0x30] sm:$0xff] %vm487_vm3, %v1143_v41  ;;  %2473 = vmatmul.mubr.msk.f32.vlgmr.msra.gmra.mrb[8].mxu1 %vm382_vm5, %v1143_v41 }
0x103c   :  { %1145 = vst.msk [vmem:[#allocation4 + $0x8] sm:$0xff] %vm490_vm4, %v1143_v41  ;;  %1611 = vmatprep.mubr.f32.mxu1 %v2981_v3  ;;  %2662 = vmatpush1.bf16.msra.mxu1 %v3434_v35  ;;  %v1542_v41 = vld [vmem:[%s3714_s5 + $0x68] sm:$0xff] }
0x103d   :  { %2664 = vmatprep.subr.bf16.mxu1 %v3445_v48 }
0x1042   :  { %v1266_v14 = vld [vmem:[#allocation4 + $0x30] sm:$0xff] }
0x110e   :  { %v1217_v0 = vpop.f32.mrb[8].mxu1 }
0x110f   :  { %v1218_v57 = vadd.f32 %v1217_v0, %v3260_v47  ;;  %v1219_v60 = vpop.f32.mrb[9].mxu1  ;;  %v1269_v47 = vld [vmem:[%s3713_s4 + $0x8] sm:$0xff]  ;;  %v1544_v0 = vld [vmem:[%s3714_s5 + $0x78] sm:$0xff] }
0x1110   :  { %v3363_v1 = vadd.f32 %v1219_v60, %v3262_v49  ;;  %v1271_v49 = vld [vmem:[%s3713_s4 + $0x18] sm:$0xff]  ;;  %v1541_v60 = vld [vmem:[%s3714_s5 + $0x60] sm:$0xff] }
0x1111   :  { %v2474_v62 = vmul.f32 -1.442695, %v1218_v57  ;;  %v2643_v9 = vpack.c.bf16 %v1271_v49, %v1269_v47  ;;  %v3481_v57 = vpack.c.bf16 %v1544_v0, %v1542_v41 }
0x1112   :  { %2873 = vtanh.f32 %v3363_v1 }
0x1113   :  { %2875 = vpow2.f32 %v2474_v62  ;;  %2644 = vmatprep.subr.bf16.mxu0 %v2643_v9  ;;  %v1263_v9 = vld [vmem:[#allocation4 + $0x18] sm:$0xff] }
0x1114   :  { %2646 = vmatpush1.bf16.msra.mxu0 %v2645_v15 }
0x1115   :  { %2648 = vmatprep.subr.bf16.mxu0 %v2647_v13 }
0x1118   :  { %2650 = vmatpush1.bf16.msra.mxu0 %v2649_v21 }
0x1119   :  { %2652 = vmatprep.subr.bf16.mxu0 %v2651_v25  ;;  %v1437_v25 = vld [vmem:[%s3716_s6] sm:$0x3] }
0x111a   :  { %v1452_v27 = vrot.slane %v1437_v25, %v252_v53 }
0x111c   :  { %v2874_v59 = vpop.eup %2873  ;;  %2654 = vmatpush1.bf16.msra.mxu0 %v2653_v22  ;;  %v1448_v22 = vrot.slane %v1437_v25, %v248_v50 }
0x111d   :  { %1237 = vrot.lane.b32.xlu1 %v2874_v59, %s2982_s3  ;;  %v2876_v6 = vpop.eup %2875  ;;  %2656 = vmatprep.subr.bf16.mxu0 %v2655_v37  ;;  %v1543_v59 = vld [vmem:[%s3714_s5 + $0x70] sm:$0xff] }
0x111e   :  { %v1228_v2 = vadd.f32 1.0, %v2876_v6  ;;  %v3489_v62 = vpack.c.bf16 %v1543_v59, %v1541_v60  ;;  %v2475_v6 = vmul.f32 -1.442695, %v3363_v1  ;;  %v1261_v1 = vld [vmem:[#allocation4 + $0x8] sm:$0xff] }
0x1120   :  { %2877 = vrcp.f32 %v1228_v2  ;;  %2658 = vmatpush1.bf16.msra.mxu0 %v2657_v39 }
0x1121   :  { %2692 = vmatprep.subr.bf16.mxu0 %v3426_v5 }
0x112a   :  { %v2878_v8 = vpop.eup %2877 }
0x112b   :  { %v1235_v23 = vmul.f32 %v2878_v8, %v1137_v34  ;;  %v3453_v34 = vpack.c.bf16 %v1535_v52, %v1533_v51 }
0x112d   :  { %2666 = vmatpush1.bf16.msra.mxu1 %v3453_v34 }
0x112e   :  { %2668 = vmatprep.subr.bf16.mxu1 %v3463_v40 }
0x1131   :  { %2670 = vmatpush1.bf16.msra.mxu1 %v3471_v63 }
0x1132   :  { %2672 = vmatprep.subr.bf16.mxu1 %v3481_v57 }
0x1135   :  { %2674 = vmatpush1.bf16.msra.mxu1 %v3489_v62 }
0x1136   :  { %2676 = vmatprep.subr.bf16.mxu1 %v3426_v5 }
0x1138   :  { %1612 = vmatmul.mubr.f32.vlgmr.msra.gmra.mrb[10].mxu1 %v2981_v3 }
0x1139   :  { %2678 = vmatpush1.bf16.msra.mxu1 %v3434_v35  ;;  %1717 = vmatprep.mubr.f32.mxu1 %v2981_v3 }
0x113a   :  { %2680 = vmatprep.subr.bf16.mxu1 %v3445_v48 }
0x113d   :  { %2682 = vmatpush1.bf16.msra.mxu1 %v3453_v34 }
0x113e   :  { %2684 = vmatprep.subr.bf16.mxu1 %v3463_v40 }
0x1141   :  { %2686 = vmatpush1.bf16.msra.mxu1 %v3471_v63 }
0x1142   :  { %2688 = vmatprep.subr.bf16.mxu1 %v3481_v57 }
0x1145   :  { %2690 = vmatpush1.bf16.msra.mxu1 %v3489_v62 }
0x1146   :  { %2708 = vmatprep.subr.bf16.mxu1 %v3426_v5 }
0x118f   :  { %v1238_v18 = vpop.permute.xlu1 %1237 }
0x1190   :  { %v1240_v4 = vmul.f32 %v2878_v8, %v1238_v18 }
0x1192   :  { %1242 = vrot.lane.b32.xlu0 %v1240_v4, %s2982_s3 }
0x1204   :  { %v1243_v28 = vpop.permute.xlu0 %1242 }
0x1205   :  { %v3398_v33 = vadd.f32 %v1243_v28, %v1235_v23 }
0x1207   :  { %2879 = vtanh.f32 %v3398_v33 }
0x1208   :  { %2881 = vpow2.f32 %v2475_v6 }
0x120b   :  { %v1613_v13 = vpop.f32.mrb[10].mxu1 }
0x120c   :  { %v1615_v17 = vpop.f32.mrb[11].mxu1 }
0x1211   :  { %v2880_v42 = vpop.eup %2879 }
0x1212   :  { %1248 = vrot.lane.b32.xlu1 %v2880_v42, %s2982_s3  ;;  %v2882_v2 = vpop.eup %2881 }
0x1213   :  { %v1229_v8 = vadd.f32 1.0, %v2882_v2 }
0x1215   :  { %2883 = vrcp.f32 %v1229_v8 }
0x121f   :  { %v2884_v18 = vpop.eup %2883 }
0x1284   :  { %v1249_v4 = vpop.permute.xlu1 %1248 }
0x1285   :  { %v1251_v47 = vmul.f32 %v2884_v18, %v1249_v4 }
0x1287   :  { %1252 = vst.msk [vmem:[#allocation4 + $0x38] sm:$0xff] %vm487_vm3, %v1251_v47 }
0x1288   :  { %1253 = vst.msk [vmem:[#allocation4] sm:$0xff] %vm490_vm4, %v1251_v47 }
0x1289   :  { %1254 = vst.msk [vmem:[%s3715_s10] sm:$0xff] %vm382_vm5, %v1251_v47 }
0x128e   :  { %v1267_v15 = vld [vmem:[#allocation4 + $0x38] sm:$0xff] }
0x128f   :  { %v1260_v49 = vld [vmem:[#allocation4] sm:$0xff] }
0x1290   :  { %2476 = vmatmul.mubr.msk.f32.vlgmr.msra.gmra.mrb[22].mxu0 %vm382_vm5, %v1260_v49 }
0x1291   :  { %1378 = vmatprep.mubr.f32.mxu0 %v2981_v3  ;;  %2694 = vmatpush1.bf16.msra.mxu0 %v3434_v35 }
0x1292   :  { %2696 = vmatprep.subr.bf16.mxu0 %v3445_v48 }
0x1294   :  { %2477 = vmatmul.mubr.msk.f32.gmra.mrb[24].mxu0 %vm382_vm5, %v1261_v1 }
0x1295   :  { %1384 = vmatprep.mubr.f32.mxu0 %v2981_v3  ;;  %2698 = vmatpush1.bf16.msra.mxu0 %v3453_v34 }
0x1296   :  { %2700 = vmatprep.subr.bf16.mxu0 %v3463_v40 }
0x1298   :  { %2478 = vmatmul.mubr.msk.f32.gmra.mrb[26].mxu0 %vm382_vm5, %v1262_v20 }
0x1299   :  { %1390 = vmatprep.mubr.f32.mxu0 %v2981_v3  ;;  %2702 = vmatpush1.bf16.msra.mxu0 %v3471_v63 }
0x129a   :  { %2704 = vmatprep.subr.bf16.mxu0 %v3481_v57 }
0x129c   :  { %2479 = vmatmul.mubr.msk.f32.gmra.mrb[28].mxu0 %vm382_vm5, %v1263_v9 }
0x129d   :  { %1396 = vmatprep.mubr.f32.mxu0 %v2981_v3  ;;  %2706 = vmatpush1.bf16.msra.mxu0 %v3489_v62 }
0x129e   :  { %2724 = vmatprep.subr.bf16.mxu0 %v3426_v5 }
0x12a0   :  { %2480 = vmatmul.mubr.msk.f32.gmra.mrb[30].mxu0 %vm382_vm5, %v1264_v10 }
0x12a1   :  { %1402 = vmatprep.mubr.f32.mxu0 %v2981_v3 }
0x12a4   :  { %2481 = vmatmul.mubr.msk.f32.gmra.mrb[32].mxu0 %vm382_vm5, %v1265_v11 }
0x12a5   :  { %1408 = vmatprep.mubr.f32.mxu0 %v2981_v3 }
0x12a8   :  { %2482 = vmatmul.mubr.msk.f32.gmra.mrb[34].mxu0 %vm382_vm5, %v1266_v14 }
0x12a9   :  { %1414 = vmatprep.mubr.f32.mxu0 %v2981_v3 }
0x12ac   :  { %2483 = vmatmul.mubr.msk.f32.gmra.mrb[36].mxu0 %vm382_vm5, %v1267_v15 }
0x12ad   :  { %1823 = vmatprep.mubr.f32.mxu0 %v2981_v3 }
0x1363   :  { %v1374_v16 = vpop.f32.mrb[22].mxu0 }
0x1364   :  { %v1376_v21 = vpop.f32.mrb[23].mxu0 }
0x1367   :  { %v1380_v23 = vpop.f32.mrb[24].mxu0 }
0x1368   :  { %v1382_v28 = vpop.f32.mrb[25].mxu0 }
0x136b   :  { %v1386_v24 = vpop.f32.mrb[26].mxu0 }
0x136c   :  { %v1388_v30 = vpop.f32.mrb[27].mxu0 }
0x136f   :  { %v1392_v19 = vpop.f32.mrb[28].mxu0 }
0x1370   :  { %v1394_v26 = vpop.f32.mrb[29].mxu0 }
0x1373   :  { %v1398_v29 = vpop.f32.mrb[30].mxu0 }
0x1374   :  { %v1483_v31 = vsel %vm3196_vm1, %v1392_v19, %v1398_v29  ;;  %v1493_v37 = vsel %vm3196_vm1, %v1398_v29, %v1392_v19  ;;  %v1400_v38 = vpop.f32.mrb[31].mxu0 }
0x1375   :  { %v1484_v39 = vsel %vm3202_vm2, %v1394_v26, %v1400_v38  ;;  %v1494_v42 = vsel %vm3202_vm2, %v1400_v38, %v1394_v26  ;;  %v3550_v12 = vadd.f32 %v1483_v31, %v1448_v22  ;;  %v3552_v50 = vadd.f32 %v1493_v37, %v1448_v22 }
0x1376   :  { %v3554_v45 = vadd.f32 %v1484_v39, %v1452_v27  ;;  %v3556_v53 = vadd.f32 %v1494_v42, %v1452_v27 }
0x1377   :  { %v1404_v43 = vpop.f32.mrb[32].mxu0 }
0x1378   :  { %v1473_v32 = vsel %vm3196_vm1, %v1386_v24, %v1404_v43  ;;  %v1503_v7 = vsel %vm3196_vm1, %v1404_v43, %v1386_v24  ;;  %v1406_v44 = vpop.f32.mrb[33].mxu0 }
0x1379   :  { %v1474_v46 = vsel %vm3202_vm2, %v1388_v30, %v1406_v44  ;;  %v1504_v51 = vsel %vm3202_vm2, %v1406_v44, %v1388_v30  ;;  %v3566_v52 = vadd.f32 %v1473_v32, %v1448_v22  ;;  %v3568_v54 = vadd.f32 %v1503_v7, %v1448_v22 }
0x137a   :  { %v3570_v36 = vadd.f32 %v1474_v46, %v1452_v27  ;;  %v3572_v55 = vadd.f32 %v1504_v51, %v1452_v27 }
0x137b   :  { %v1410_v61 = vpop.f32.mrb[34].mxu0 }
0x137c   :  { %v1463_v41 = vsel %vm3196_vm1, %v1380_v23, %v1410_v61  ;;  %v1513_v0 = vsel %vm3196_vm1, %v1410_v61, %v1380_v23  ;;  %v1412_v60 = vpop.f32.mrb[35].mxu0 }
0x137d   :  { %v1464_v59 = vsel %vm3202_vm2, %v1382_v28, %v1412_v60  ;;  %v1514_v6 = vsel %vm3202_vm2, %v1412_v60, %v1382_v28  ;;  %v1465_v2 = vadd.f32 %v1463_v41, %v1448_v22  ;;  %v3582_v8 = vadd.f32 %v1513_v0, %v1448_v22 }
0x137e   :  { %v1466_v18 = vadd.f32 %v1464_v59, %v1452_v27  ;;  %v3584_v4 = vadd.f32 %v1514_v6, %v1452_v27 }
0x137f   :  { %v1416_v47 = vpop.f32.mrb[36].mxu0 }
0x1380   :  { %v1442_v49 = vsel %vm3196_vm1, %v1374_v16, %v1416_v47  ;;  %v1523_v1 = vsel %vm3196_vm1, %v1416_v47, %v1374_v16  ;;  %v1418_v20 = vpop.f32.mrb[37].mxu0 }
0x1381   :  { %v1443_v9 = vsel %vm3202_vm2, %v1376_v21, %v1418_v20  ;;  %v1524_v10 = vsel %vm3202_vm2, %v1418_v20, %v1376_v21  ;;  %v1455_v11 = vadd.f32 %v1448_v22, %v1442_v49  ;;  %v3594_v14 = vadd.f32 %v1523_v1, %v1448_v22 }
0x1382   :  { %v1456_v15 = vadd.f32 %v1452_v27, %v1443_v9  ;;  %v3596_v23 = vadd.f32 %v1524_v10, %v1452_v27 }
0x1383   :  { %v1614_v28 = vadd.f32 %v1613_v13, %v1455_v11 }
0x1384   :  { %v1616_v24 = vadd.f32 %v1615_v17, %v1456_v15 }
0x1385   :  { %v2484_v56 = vmul.f32 -1.442695, %v1614_v28 }
0x1386   :  { %2885 = vtanh.f32 %v1616_v24  ;;  %v2485_v17 = vmul.f32 -1.442695, %v1616_v24 }
0x1387   :  { %2887 = vpow2.f32 %v2484_v56 }
0x1390   :  { %v2886_v30 = vpop.eup %2885 }
0x1391   :  { %1633 = vrot.lane.b32.xlu0 %v2886_v30, %s2982_s3  ;;  %v2888_v16 = vpop.eup %2887 }
0x1392   :  { %v1624_v25 = vadd.f32 1.0, %v2888_v16 }
0x1394   :  { %2889 = vrcp.f32 %v1624_v25 }
0x139e   :  { %v2890_v19 = vpop.eup %2889 }
0x139f   :  { %v1631_v26 = vmul.f32 0.0, %v2890_v19 }
0x1403   :  { %v1634_v58 = vpop.permute.xlu0 %1633 }
0x1404   :  { %v1636_v21 = vmul.f32 %v2890_v19, %v1634_v58 }
0x1406   :  { %1638 = vrot.lane.b32.xlu1 %v1636_v21, %s2982_s3 }
0x1478   :  { %v1639_v22 = vpop.permute.xlu1 %1638 }
0x1479   :  { %v1641_v27 = vadd.f32 %v1639_v22, %v1631_v26 }
0x147b   :  { %2891 = vtanh.f32 %v1641_v27 }
0x147c   :  { %2893 = vpow2.f32 %v2485_v17 }
0x1485   :  { %v2892_v13 = vpop.eup %2891 }
0x1486   :  { %1644 = vrot.lane.b32.xlu0 %v2892_v13, %s2982_s3  ;;  %v2894_v29 = vpop.eup %2893 }
0x1487   :  { %v1625_v31 = vadd.f32 1.0, %v2894_v29 }
0x1489   :  { %2895 = vrcp.f32 %v1625_v31 }
0x1493   :  { %v2896_v37 = vpop.eup %2895 }
0x14f8   :  { %v1645_v38 = vpop.permute.xlu0 %1644 }
0x14f9   :  { %v1647_v39 = vmul.f32 %v2896_v37, %v1645_v38 }
0x14fb   :  { %2486 = vmatmul.mubr.msk.f32.vlgmr.msra.gmra.mrb[12].mxu1 %vm382_vm5, %v1647_v39 }
0x14fc   :  { %2710 = vmatpush1.bf16.msra.mxu1 %v3434_v35  ;;  %1929 = vmatprep.mubr.f32.mxu1 %v2981_v3 }
0x14fd   :  { %2712 = vmatprep.subr.bf16.mxu1 %v3445_v48 }
0x1500   :  { %2714 = vmatpush1.bf16.msra.mxu1 %v3453_v34 }
0x1501   :  { %2716 = vmatprep.subr.bf16.mxu1 %v3463_v40 }
0x1504   :  { %2718 = vmatpush1.bf16.msra.mxu1 %v3471_v63 }
0x1505   :  { %2720 = vmatprep.subr.bf16.mxu1 %v3481_v57 }
0x1508   :  { %2722 = vmatpush1.bf16.msra.mxu1 %v3489_v62 }
0x1509   :  { %2740 = vmatprep.subr.bf16.mxu1 %v3426_v5 }
0x15ce   :  { %v1719_v42 = vpop.f32.mrb[12].mxu1 }
0x15cf   :  { %v1720_v43 = vadd.f32 %v1719_v42, %v1465_v2  ;;  %v1721_v32 = vpop.f32.mrb[13].mxu1 }
0x15d0   :  { %v1722_v7 = vadd.f32 %v1721_v32, %v1466_v18 }
0x15d1   :  { %v2487_v46 = vmul.f32 -1.442695, %v1720_v43 }
0x15d2   :  { %2897 = vtanh.f32 %v1722_v7  ;;  %v2488_v18 = vmul.f32 -1.442695, %v1722_v7 }
0x15d3   :  { %2899 = vpow2.f32 %v2487_v46 }
0x15dc   :  { %v2898_v44 = vpop.eup %2897 }
0x15dd   :  { %1739 = vrot.lane.b32.xlu1 %v2898_v44, %s2982_s3  ;;  %v2900_v51 = vpop.eup %2899 }
0x15de   :  { %v1730_v61 = vadd.f32 1.0, %v2900_v51 }
0x15e0   :  { %2901 = vrcp.f32 %v1730_v61 }
0x15ea   :  { %v2902_v41 = vpop.eup %2901 }
0x15eb   :  { %v1737_v59 = vmul.f32 %v2902_v41, %v1641_v27 }
0x164f   :  { %v1740_v0 = vpop.permute.xlu1 %1739 }
0x1650   :  { %v1742_v60 = vmul.f32 %v2902_v41, %v1740_v0 }
0x1652   :  { %1744 = vrot.lane.b32.xlu0 %v1742_v60, %s2982_s3 }
0x16c4   :  { %v1745_v6 = vpop.permute.xlu0 %1744 }
0x16c5   :  { %v1747_v47 = vadd.f32 %v1745_v6, %v1737_v59 }
0x16c7   :  { %2903 = vtanh.f32 %v1747_v47 }
0x16c8   :  { %2905 = vpow2.f32 %v2488_v18 }
0x16d1   :  { %v2904_v2 = vpop.eup %2903 }
0x16d2   :  { %1750 = vrot.lane.b32.xlu1 %v2904_v2, %s2982_s3  ;;  %v2906_v49 = vpop.eup %2905 }
0x16d3   :  { %v1731_v1 = vadd.f32 1.0, %v2906_v49 }
0x16d5   :  { %2907 = vrcp.f32 %v1731_v1 }
0x16df   :  { %v2908_v20 = vpop.eup %2907 }
0x1744   :  { %v1751_v9 = vpop.permute.xlu1 %1750 }
0x1745   :  { %v1753_v10 = vmul.f32 %v2908_v20, %v1751_v9 }
0x1747   :  { %2489 = vmatmul.mubr.msk.f32.vlgmr.msra.gmra.mrb[38].mxu0 %vm382_vm5, %v1753_v10 }
0x1748   :  { %2726 = vmatpush1.bf16.msra.mxu0 %v3434_v35  ;;  %2035 = vmatprep.mubr.f32.mxu0 %v2981_v3 }
0x1749   :  { %2728 = vmatprep.subr.bf16.mxu0 %v3445_v48 }
0x174c   :  { %2730 = vmatpush1.bf16.msra.mxu0 %v3453_v34 }
0x174d   :  { %2732 = vmatprep.subr.bf16.mxu0 %v3463_v40 }
0x1750   :  { %2734 = vmatpush1.bf16.msra.mxu0 %v3471_v63 }
0x1751   :  { %2736 = vmatprep.subr.bf16.mxu0 %v3481_v57 }
0x1754   :  { %2738 = vmatpush1.bf16.msra.mxu0 %v3489_v62 }
0x1755   :  { %2756 = vmatprep.subr.bf16.mxu0 %v3426_v5 }
0x181a   :  { %v1825_v11 = vpop.f32.mrb[38].mxu0 }
0x181b   :  { %v1826_v15 = vadd.f32 %v1825_v11, %v3566_v52  ;;  %v1827_v28 = vpop.f32.mrb[39].mxu0 }
0x181c   :  { %v1828_v24 = vadd.f32 %v1827_v28, %v3570_v36 }
0x181d   :  { %v2490_v56 = vmul.f32 -1.442695, %v1826_v15 }
0x181e   :  { %2909 = vtanh.f32 %v1828_v24  ;;  %v2491_v36 = vmul.f32 -1.442695, %v1828_v24 }
0x181f   :  { %2911 = vpow2.f32 %v2490_v56 }
0x1828   :  { %v2910_v30 = vpop.eup %2909 }
0x1829   :  { %1845 = vrot.lane.b32.xlu0 %v2910_v30, %s2982_s3  ;;  %v2912_v16 = vpop.eup %2911 }
0x182a   :  { %v1836_v25 = vadd.f32 1.0, %v2912_v16 }
0x182c   :  { %2913 = vrcp.f32 %v1836_v25 }
0x1836   :  { %v2914_v19 = vpop.eup %2913 }
0x1837   :  { %v1843_v26 = vmul.f32 %v2914_v19, %v1747_v47 }
0x189b   :  { %v1846_v58 = vpop.permute.xlu0 %1845 }
0x189c   :  { %v1848_v21 = vmul.f32 %v2914_v19, %v1846_v58 }
0x189e   :  { %1850 = vrot.lane.b32.xlu1 %v1848_v21, %s2982_s3 }
0x1910   :  { %v1851_v22 = vpop.permute.xlu1 %1850 }
0x1911   :  { %v1853_v52 = vadd.f32 %v1851_v22, %v1843_v26 }
0x1913   :  { %2915 = vtanh.f32 %v1853_v52 }
0x1914   :  { %2917 = vpow2.f32 %v2491_v36 }
0x191d   :  { %v2916_v27 = vpop.eup %2915 }
0x191e   :  { %1856 = vrot.lane.b32.xlu0 %v2916_v27, %s2982_s3  ;;  %v2918_v13 = vpop.eup %2917 }
0x191f   :  { %v1837_v17 = vadd.f32 1.0, %v2918_v13 }
0x1921   :  { %2919 = vrcp.f32 %v1837_v17 }
0x192b   :  { %v2920_v29 = vpop.eup %2919 }
0x1990   :  { %v1857_v31 = vpop.permute.xlu0 %1856 }
0x1991   :  { %v1859_v37 = vmul.f32 %v2920_v29, %v1857_v31 }
0x1993   :  { %2492 = vmatmul.mubr.msk.f32.vlgmr.msra.gmra.mrb[14].mxu1 %vm382_vm5, %v1859_v37 }
0x1994   :  { %2742 = vmatpush1.bf16.msra.mxu1 %v3434_v35  ;;  %2141 = vmatprep.mubr.f32.mxu1 %v2981_v3 }
0x1995   :  { %2744 = vmatprep.subr.bf16.mxu1 %v3445_v48 }
0x1998   :  { %2746 = vmatpush1.bf16.msra.mxu1 %v3453_v34 }
0x1999   :  { %2748 = vmatprep.subr.bf16.mxu1 %v3463_v40 }
0x199c   :  { %2750 = vmatpush1.bf16.msra.mxu1 %v3471_v63 }
0x199d   :  { %2752 = vmatprep.subr.bf16.mxu1 %v3481_v57 }
0x19a0   :  { %2754 = vmatpush1.bf16.msra.mxu1 %v3489_v62 }
0x19a1   :  { %2772 = vmatprep.subr.bf16.mxu1 %v3426_v5 }
0x1a66   :  { %v1931_v38 = vpop.f32.mrb[14].mxu1 }
0x1a67   :  { %v1932_v39 = vadd.f32 %v1931_v38, %v3550_v12  ;;  %v1933_v42 = vpop.f32.mrb[15].mxu1 }
0x1a68   :  { %v1934_v43 = vadd.f32 %v1933_v42, %v3554_v45 }
0x1a69   :  { %v2493_v7 = vmul.f32 -1.442695, %v1932_v39 }
0x1a6a   :  { %2921 = vtanh.f32 %v1934_v43  ;;  %v2494_v45 = vmul.f32 -1.442695, %v1934_v43 }
0x1a6b   :  { %2923 = vpow2.f32 %v2493_v7 }
0x1a74   :  { %v2922_v32 = vpop.eup %2921 }
0x1a75   :  { %1951 = vrot.lane.b32.xlu1 %v2922_v32, %s2982_s3  ;;  %v2924_v44 = vpop.eup %2923 }
0x1a76   :  { %v1942_v46 = vadd.f32 1.0, %v2924_v44 }
0x1a78   :  { %2925 = vrcp.f32 %v1942_v46 }
0x1a82   :  { %v2926_v51 = vpop.eup %2925 }
0x1a83   :  { %v1949_v5 = vmul.f32 %v2926_v51, %v1853_v52 }
0x1ae7   :  { %v1952_v61 = vpop.permute.xlu1 %1951 }
0x1ae8   :  { %v1954_v41 = vmul.f32 %v2926_v51, %v1952_v61 }
0x1aea   :  { %1956 = vrot.lane.b32.xlu0 %v1954_v41, %s2982_s3 }
0x1b5c   :  { %v1957_v0 = vpop.permute.xlu0 %1956 }
0x1b5d   :  { %v1959_v12 = vadd.f32 %v1957_v0, %v1949_v5 }
0x1b5f   :  { %2927 = vtanh.f32 %v1959_v12 }
0x1b60   :  { %2929 = vpow2.f32 %v2494_v45 }
0x1b69   :  { %v2928_v60 = vpop.eup %2927 }
0x1b6a   :  { %1962 = vrot.lane.b32.xlu1 %v2928_v60, %s2982_s3  ;;  %v2930_v59 = vpop.eup %2929 }
0x1b6b   :  { %v1943_v6 = vadd.f32 1.0, %v2930_v59 }
0x1b6d   :  { %2931 = vrcp.f32 %v1943_v6 }
0x1b77   :  { %v2932_v47 = vpop.eup %2931 }
0x1bdc   :  { %v1963_v2 = vpop.permute.xlu1 %1962 }
0x1bdd   :  { %v1965_v18 = vmul.f32 %v2932_v47, %v1963_v2 }
0x1bdf   :  { %2495 = vmatmul.mubr.msk.f32.vlgmr.msra.gmra.mrb[40].mxu0 %vm382_vm5, %v1965_v18 }
0x1be0   :  { %2758 = vmatpush1.bf16.msra.mxu0 %v3434_v35  ;;  %2247 = vmatprep.mubr.f32.mxu0 %v2981_v3 }
0x1be1   :  { %2760 = vmatprep.subr.bf16.mxu0 %v3445_v48 }
0x1be4   :  { %2762 = vmatpush1.bf16.msra.mxu0 %v3453_v34 }
0x1be5   :  { %2764 = vmatprep.subr.bf16.mxu0 %v3463_v40 }
0x1be8   :  { %2766 = vmatpush1.bf16.msra.mxu0 %v3471_v63 }
0x1be9   :  { %2768 = vmatprep.subr.bf16.mxu0 %v3481_v57 }
0x1bec   :  { %2770 = vmatpush1.bf16.msra.mxu0 %v3489_v62 }
0x1cb2   :  { %v2037_v49 = vpop.f32.mrb[40].mxu0 }
0x1cb3   :  { %v2038_v1 = vadd.f32 %v2037_v49, %v3552_v50  ;;  %v2039_v20 = vpop.f32.mrb[41].mxu0 }
0x1cb4   :  { %v2040_v9 = vadd.f32 %v2039_v20, %v3556_v53 }
0x1cb5   :  { %v2496_v11 = vmul.f32 -1.442695, %v2038_v1 }
0x1cb6   :  { %2933 = vtanh.f32 %v2040_v9  ;;  %v2497_v53 = vmul.f32 -1.442695, %v2040_v9 }
0x1cb7   :  { %2935 = vpow2.f32 %v2496_v11 }
0x1cc0   :  { %v2934_v10 = vpop.eup %2933 }
0x1cc1   :  { %2057 = vrot.lane.b32.xlu0 %v2934_v10, %s2982_s3  ;;  %v2936_v15 = vpop.eup %2935 }
0x1cc2   :  { %v2048_v28 = vadd.f32 1.0, %v2936_v15 }
0x1cc4   :  { %2937 = vrcp.f32 %v2048_v28 }
0x1cce   :  { %v2938_v24 = vpop.eup %2937 }
0x1ccf   :  { %v2055_v16 = vmul.f32 %v2938_v24, %v1959_v12 }
0x1d33   :  { %v2058_v30 = vpop.permute.xlu0 %2057 }
0x1d34   :  { %v2060_v56 = vmul.f32 %v2938_v24, %v2058_v30 }
0x1d36   :  { %2062 = vrot.lane.b32.xlu1 %v2060_v56, %s2982_s3 }
0x1da8   :  { %v2063_v25 = vpop.permute.xlu1 %2062 }
0x1da9   :  { %v2065_v50 = vadd.f32 %v2063_v25, %v2055_v16 }
0x1dab   :  { %2939 = vtanh.f32 %v2065_v50 }
0x1dac   :  { %2941 = vpow2.f32 %v2497_v53 }
0x1db5   :  { %v2940_v19 = vpop.eup %2939 }
0x1db6   :  { %2068 = vrot.lane.b32.xlu0 %v2940_v19, %s2982_s3  ;;  %v2942_v58 = vpop.eup %2941 }
0x1db7   :  { %v2049_v21 = vadd.f32 1.0, %v2942_v58 }
0x1db9   :  { %2943 = vrcp.f32 %v2049_v21 }
0x1dc3   :  { %v2944_v26 = vpop.eup %2943 }
0x1e28   :  { %v2069_v22 = vpop.permute.xlu0 %2068 }
0x1e29   :  { %v2071_v52 = vmul.f32 %v2944_v26, %v2069_v22 }
0x1e2b   :  { %2498 = vmatmul.mubr.msk.f32.vlgmr.msra.gmra.mrb[16].mxu1 %vm382_vm5, %v2071_v52 }
0x1e2c   :  { %2774 = vmatpush1.bf16.msra.mxu1 %v3434_v35  ;;  %2353 = vmatprep.mubr.f32.mxu1 %v2981_v3 }
0x1e2d   :  { %2776 = vmatprep.subr.bf16.mxu1 %v3445_v48 }
0x1e30   :  { %2778 = vmatpush1.bf16.msra.mxu1 %v3453_v34 }
0x1e31   :  { %2780 = vmatprep.subr.bf16.mxu1 %v3463_v40 }
0x1e34   :  { %2782 = vmatpush1.bf16.msra.mxu1 %v3471_v63 }
0x1e35   :  { %2784 = vmatprep.subr.bf16.mxu1 %v3481_v57 }
0x1e38   :  { %2786 = vmatpush1.bf16.msra.mxu1 %v3489_v62 }
0x1efe   :  { %v2143_v27 = vpop.f32.mrb[16].mxu1 }
0x1eff   :  { %v2144_v36 = vadd.f32 %v2143_v27, %v3568_v54  ;;  %v2145_v13 = vpop.f32.mrb[17].mxu1  ;;  %v2509_v27 = vld [vmem:[%s3718_s7] ss:$0 sm:$0xff] }
0x1f00   :  { %v2146_v35 = vadd.f32 %v2145_v13, %v3572_v55 }
0x1f01   :  { %v2499_v48 = vmul.f32 -1.442695, %v2144_v36 }
0x1f02   :  { %2945 = vtanh.f32 %v2146_v35  ;;  %v2500_v55 = vmul.f32 -1.442695, %v2146_v35 }
0x1f03   :  { %2947 = vpow2.f32 %v2499_v48 }
0x1f0c   :  { %v2946_v3 = vpop.eup %2945 }
0x1f0d   :  { %2163 = vrot.lane.b32.xlu1 %v2946_v3, %s2982_s3  ;;  %v2948_v34 = vpop.eup %2947 }
0x1f0e   :  { %v2154_v40 = vadd.f32 1.0, %v2948_v34 }
0x1f10   :  { %2949 = vrcp.f32 %v2154_v40 }
0x1f1a   :  { %v2950_v63 = vpop.eup %2949 }
0x1f1b   :  { %v2161_v62 = vmul.f32 %v2950_v63, %v2065_v50 }
0x1f7f   :  { %v2164_v17 = vpop.permute.xlu1 %2163 }
0x1f80   :  { %v2166_v57 = vmul.f32 %v2950_v63, %v2164_v17 }
0x1f82   :  { %2168 = vrot.lane.b32.xlu0 %v2166_v57, %s2982_s3 }
0x1ff4   :  { %v2169_v29 = vpop.permute.xlu0 %2168 }
0x1ff5   :  { %v2171_v54 = vadd.f32 %v2169_v29, %v2161_v62 }
0x1ff7   :  { %2951 = vtanh.f32 %v2171_v54 }
0x1ff8   :  { %2953 = vpow2.f32 %v2500_v55 }
0x2001   :  { %v2952_v31 = vpop.eup %2951 }
0x2002   :  { %2174 = vrot.lane.b32.xlu1 %v2952_v31, %s2982_s3  ;;  %v2954_v37 = vpop.eup %2953 }
0x2003   :  { %v2155_v38 = vadd.f32 1.0, %v2954_v37 }
0x2005   :  { %2955 = vrcp.f32 %v2155_v38 }
0x200f   :  { %v2956_v39 = vpop.eup %2955 }
0x2074   :  { %v2175_v42 = vpop.permute.xlu1 %2174 }
0x2075   :  { %v2177_v43 = vmul.f32 %v2956_v39, %v2175_v42 }
0x2077   :  { %2501 = vmatmul.mubr.msk.f32.vlgmr.msra.gmra.mrb[42].mxu0 %vm382_vm5, %v2177_v43 }
0x214a   :  { %v2249_v32 = vpop.f32.mrb[42].mxu0 }
0x214b   :  { %v2250_v7 = vadd.f32 %v2249_v32, %v3582_v8  ;;  %v2251_v44 = vpop.f32.mrb[43].mxu0 }
0x214c   :  { %v2252_v46 = vadd.f32 %v2251_v44, %v3584_v4 }
0x214d   :  { %v2502_v61 = vmul.f32 -1.442695, %v2250_v7 }
0x214e   :  { %2957 = vtanh.f32 %v2252_v46  ;;  %v2503_v4 = vmul.f32 -1.442695, %v2252_v46 }
0x214f   :  { %2959 = vpow2.f32 %v2502_v61 }
0x2158   :  { %v2958_v51 = vpop.eup %2957 }
0x2159   :  { %2269 = vrot.lane.b32.xlu0 %v2958_v51, %s2982_s3  ;;  %v2960_v41 = vpop.eup %2959 }
0x215a   :  { %v2260_v5 = vadd.f32 1.0, %v2960_v41 }
0x215c   :  { %2961 = vrcp.f32 %v2260_v5 }
0x2166   :  { %v2962_v0 = vpop.eup %2961 }
0x2167   :  { %v2267_v45 = vmul.f32 %v2962_v0, %v2171_v54 }
0x21cb   :  { %v2270_v12 = vpop.permute.xlu0 %2269 }
0x21cc   :  { %v2272_v60 = vmul.f32 %v2962_v0, %v2270_v12 }
0x21ce   :  { %2274 = vrot.lane.b32.xlu1 %v2272_v60, %s2982_s3 }
0x2240   :  { %v2275_v59 = vpop.permute.xlu1 %2274 }
0x2241   :  { %v2277_v8 = vadd.f32 %v2275_v59, %v2267_v45 }
0x2243   :  { %2963 = vtanh.f32 %v2277_v8 }
0x2244   :  { %2965 = vpow2.f32 %v2503_v4 }
0x224d   :  { %v2964_v6 = vpop.eup %2963 }
0x224e   :  { %2280 = vrot.lane.b32.xlu0 %v2964_v6, %s2982_s3  ;;  %v2966_v47 = vpop.eup %2965 }
0x224f   :  { %v2261_v2 = vadd.f32 1.0, %v2966_v47 }
0x2251   :  { %2967 = vrcp.f32 %v2261_v2 }
0x225b   :  { %v2968_v18 = vpop.eup %2967 }
0x22c0   :  { %v2281_v49 = vpop.permute.xlu0 %2280 }
0x22c1   :  { %v2283_v1 = vmul.f32 %v2968_v18, %v2281_v49 }
0x22c3   :  { %2504 = vmatmul.mubr.msk.f32.vlgmr.msra.gmra.mrb[18].mxu1 %vm382_vm5, %v2283_v1 }
0x2396   :  { %v2355_v20 = vpop.f32.mrb[18].mxu1 }
0x2397   :  { %v2356_v9 = vadd.f32 %v2355_v20, %v3594_v14  ;;  %v2357_v10 = vpop.f32.mrb[19].mxu1 }
0x2398   :  { %v2358_v11 = vadd.f32 %v2357_v10, %v3596_v23  ;;  %v17_v23 = vstv %s3717_s8 }
0x2399   :  { %v2505_v28 = vmul.f32 -1.442695, %v2356_v9  ;;  %18 = vst [vmem:[#allocation5] sm:$0x1] %v17_v23 }
0x239a   :  { %2969 = vtanh.f32 %v2358_v11  ;;  %v2506_v58 = vmul.f32 -1.442695, %v2358_v11 }
0x239b   :  { %2971 = vpow2.f32 %v2505_v28 }
0x23a0   :  { %v2510_v48 = vld [vmem:[#allocation5] ss:$0 sm:$0xff] }
0x23a4   :  { %v2970_v15 = vpop.eup %2969 }
0x23a5   :  { %2375 = vrot.lane.b32.xlu1 %v2970_v15, %s2982_s3  ;;  %v2972_v24 = vpop.eup %2971 }
0x23a6   :  { %v2366_v30 = vadd.f32 1.0, %v2972_v24 }
0x23a8   :  { %2973 = vrcp.f32 %v2366_v30 }
0x23b2   :  { %v2974_v56 = vpop.eup %2973 }
0x23b3   :  { %v2373_v50 = vmul.f32 %v2974_v56, %v2277_v8 }
0x2417   :  { %v2376_v16 = vpop.permute.xlu1 %2375 }
0x2418   :  { %v2378_v25 = vmul.f32 %v2974_v56, %v2376_v16 }
0x241a   :  { %2380 = vrot.lane.b32.xlu0 %v2378_v25, %s2982_s3 }
0x248c   :  { %v2381_v19 = vpop.permute.xlu0 %2380 }
0x248d   :  { %v2383_v14 = vadd.f32 %v2381_v19, %v2373_v50 }
0x248f   :  { %2975 = vtanh.f32 %v2383_v14 }
0x2490   :  { %2977 = vpow2.f32 %v2506_v58 }
0x2499   :  { %v2976_v53 = vpop.eup %2975 }
0x249a   :  { %2386 = vrot.lane.b32.xlu1 %v2976_v53, %s2982_s3  ;;  %v2978_v21 = vpop.eup %2977 }
0x249b   :  { %v2367_v26 = vadd.f32 1.0, %v2978_v21 }
0x249d   :  { %2979 = vrcp.f32 %v2367_v26 }
0x249e   :  { %1256 = vrot.lane.b32.xlu1 %v3398_v33, %s2982_s3 }
0x24a2   :  { %2393 = vrot.lane.b32.xlu1 %v2383_v14, %s2982_s3 }
0x24a7   :  { %v2980_v22 = vpop.eup %2979 }
0x250c   :  { %v2387_v52 = vpop.permute.xlu1 %2386 }
0x250d   :  { %v2389_v36 = vmul.f32 %v2980_v22, %v2387_v52 }
0x250f   :  { %2507 = vst.msk [vmem:[%s3715_s10 + $0x8] sm:$0xff] %vm382_vm5, %v2389_v36  ;;  %v2405_v33 = vmul.f32 %v2509_v27, %v2389_v36 }
0x2510   :  { %v1257_v13 = vpop.permute.xlu1 %1256 }
0x2511   :  { %1259 = vst.msk [vmem:[%s3719_s11] sm:$0xff] %vm382_vm5, %v1257_v13  ;;  %v2406_v35 = vsel %vm382_vm5, %v2405_v33, 0.0 }
0x2512   :  { %2407 = vadd.xlane.f32.xlu0 %v2406_v35 }
0x2514   :  { %v2394_v3 = vpop.permute.xlu1 %2393 }
0x2515   :  { %2508 = vst.msk [vmem:[%s3719_s11 + $0x8] sm:$0xff] %vm382_vm5, %v2394_v3 }
0x259f   :  { %v2408_v34 = vpop.xlane.xlu0 %2407 }
0x25a0   :  { %v2416_v40 = vadd.f32 %v2510_v48, %v2408_v34 }
0x25a2   :  { %2418 = vst.msk [vmem:[%s3720_s9] sm:$0xff] %vm2417_vm6, %v2416_v40 }

</bundles_post_ra>
